<compile_context>
chip_gen: v6e
topology: v6e:2x2x1
jax: 0.10.0
libtpu: 0.0.40
codegen_flags: <defaults>
</compile_context>

<pallas_src>
import jax
import jax.numpy as jnp
from jax import lax
from jax.experimental import pallas as pl
from jax.experimental.pallas import tpu as pltpu

EPS = 1e-5  # nn.InstanceNorm2d default eps


def _make_kernel(H, W, C, Bb):
    HW = H * W
    N = Bb * HW
    # 3x3 taps in (dy, dx) order; tap index k == (dy+1)*3 + (dx+1) matches the
    # host-side weight flattening.
    taps = [(dy, dx) for dy in (-1, 0, 1) for dx in (-1, 0, 1)]
    # roll amount so that rolled[p] == x[p + dy*W + dx] (jnp.roll semantics).
    # Cross-image bleed / wraparound only hits lanes that the boundary mask
    # zeroes, so one global roll over the concatenated lane axis is exact.
    shifts = [(-(dy * W + dx)) % N for dy, dx in taps]
    needs_mask = [not (dy == 0 and dx == 0) for dy, dx in taps]

    def kernel(lr_ref, ref_ref, mask_ref, w1_ref, wgb_ref, out_ref, patch_ref):
        # ---- per-image statistics & InstanceNorm(ref): f32, (C, HW) -------
        lr_imgs, lr_mu, lr_sd, ref_n = [], [], [], []
        for b in range(Bb):
            r = ref_ref[b]                                        # (C, HW)
            mu = jnp.mean(r, axis=1, keepdims=True)
            var = jnp.mean((r - mu) ** 2, axis=1, keepdims=True)  # biased
            ref_n.append((r - mu) * lax.rsqrt(var + EPS))

            l = lr_ref[b]                                         # (C, HW)
            m = jnp.mean(l, axis=1, keepdims=True)
            sd = jnp.sqrt(jnp.sum((l - m) ** 2, axis=1, keepdims=True)
                          / (HW - 1))                             # torch.std
            lr_imgs.append(l)
            lr_mu.append(m)
            lr_sd.append(sd)

        lr2 = lr_imgs[0] if Bb == 1 else jnp.concatenate(lr_imgs, axis=-1)

        # ---- boundary masks: load once, broadcast to (C, N) once ----------
        mask9 = mask_ref[...]                                     # (9, N) f32
        mask_b = [jnp.broadcast_to(mask9[k:k + 1, :], (C, N))
                  if needs_mask[k] else None for k in range(9)]

        # ones row for the fused bias (patch row 9*C), written every step
        patch_ref[pl.ds(9 * C, 1), :] = jnp.ones((1, N), jnp.float32)

        def im2col_into_patch(x2):
            # x2: (C, N) f32 -> patch rows k*C:(k+1)*C (tap-major layout that
            # matches the host-side weight flattening).
            for k, s in enumerate(shifts):
                shifted = x2 if s == 0 else pltpu.roll(x2, shift=s, axis=1)
                if mask_b[k] is not None:
                    shifted = shifted * mask_b[k]
                patch_ref[pl.ds(k * C, C), :] = shifted

        # ---- x = ReLU(conv3x3(lr)): one (C,9C+1)@(9C+1,N) bf16 MXU matmul -
        im2col_into_patch(lr2)
        x2 = jnp.dot(w1_ref[...], patch_ref[...].astype(jnp.bfloat16),
                     preferred_element_type=jnp.float32)
        x2 = jnp.maximum(x2, 0.0)

        # ---- fused gamma|beta conv: one (2C,9C+1)@(9C+1,N) bf16 matmul ----
        im2col_into_patch(x2)
        gb = jnp.dot(wgb_ref[...], patch_ref[...].astype(jnp.bfloat16),
                     preferred_element_type=jnp.float32)          # (2C, N)

        # ---- combine per image & store lane-aligned (C, HW) slices --------
        for b in range(Bb):
            lo, hi = b * HW, (b + 1) * HW
            gamma = gb[:C, lo:hi] + lr_sd[b]
            beta = gb[C:, lo:hi] + lr_mu[b]
            out_ref[b] = (ref_n[b] * gamma + beta).astype(out_ref.dtype)

    return kernel


def modality_norm(lr, ref, params):
    """lr, ref: (B, C, H, W) float32 NCHW (PyTorch convention). Returns NCHW.

    Only free reshapes are done on the host; no transposes, no padding.
    """
    B, C, H, W = lr.shape
    HW = H * W

    # Fold batches into each grid step.  Keep a 2-step "parallel" grid when B
    # is even so both v7x TensorCores are used; otherwise one step.
    num_steps = 2 if (B % 2 == 0 and B >= 2) else 1
    Bb = B // num_steps
    N = Bb * HW

    lr_f = lr.reshape(B, C, HW).astype(jnp.float32)
    ref_f = ref.reshape(B, C, HW).astype(jnp.float32)

    # --- weights: tap-major flatten + fused bias column, bf16 operands -----
    def flat_w(w_oihw, bias):  # (O, I, 3, 3), (O,) -> (O, 9*I + 1) bf16
        O, I = w_oihw.shape[0], w_oihw.shape[1]
        wf = jnp.transpose(w_oihw, (0, 2, 3, 1)).reshape(O, 9 * I)
        wf = jnp.concatenate([wf, bias.reshape(O, 1)], axis=1)
        return wf.astype(jnp.bfloat16)

    w1 = flat_w(params["conv_w"], params["conv_b"])                 # (C, 9C+1)
    wgb = jnp.concatenate(
        [flat_w(params["gamma_w"], params["gamma_b"]),
         flat_w(params["beta_w"], params["beta_b"])], axis=0)       # (2C, 9C+1)

    # --- precomputed per-tap boundary masks (9, N); DMA'd once -------------
    pos = jnp.arange(HW)
    rr, cc = pos // W, pos % W
    rows = []
    for dy in (-1, 0, 1):
        for dx in (-1, 0, 1):
            m = jnp.ones((HW,), jnp.float32)
            if dy == -1:
                m = m * (rr >= 1).astype(jnp.float32)
            if dy == 1:
                m = m * (rr <= H - 2).astype(jnp.float32)
            if dx == -1:
                m = m * (cc >= 1).astype(jnp.float32)
            if dx == 1:
                m = m * (cc <= W - 2).astype(jnp.float32)
            rows.append(m)
    mask = jnp.tile(jnp.stack(rows, axis=0), (1, Bb))               # (9, N)

    # NOTE: demo C=8 is already a multiple of 8; pad C up to a multiple of 8
    # on the host for production channel counts to keep sublane alignment.
    grid_spec = pltpu.PrefetchScalarGridSpec(
        num_scalar_prefetch=0,
        grid=(num_steps,),
        in_specs=[
            pl.BlockSpec((Bb, C, HW), lambda s: (s, 0, 0)),      # lr
            pl.BlockSpec((Bb, C, HW), lambda s: (s, 0, 0)),      # ref
            pl.BlockSpec((9, N), lambda s: (0, 0)),              # boundary masks
            pl.BlockSpec((C, 9 * C + 1), lambda s: (0, 0)),      # conv w|b
            pl.BlockSpec((2 * C, 9 * C + 1), lambda s: (0, 0)),  # gamma|beta w|b
        ],
        out_specs=pl.BlockSpec((Bb, C, HW), lambda s: (s, 0, 0)),
        scratch_shapes=[pltpu.VMEM((9 * C + 1, N), jnp.float32)],  # im2col patch
    )

    out = pl.pallas_call(
        _make_kernel(H, W, C, Bb),
        out_shape=jax.ShapeDtypeStruct((B, C, HW), jnp.float32),
        grid_spec=grid_spec,
        compiler_params=pltpu.CompilerParams(
            dimension_semantics=("parallel",)),
    )(lr_f, ref_f, mask, w1, wgb)

    return out.reshape(B, C, H, W)


def reference(lr, ref, params):
    """Pure-JAX NCHW reference mirroring the PyTorch forward.

    Conv inputs/weights/biases are cast to bf16 (f32 accumulation) to match
    the kernel's bf16 MXU operands; everything else stays f32.
    """
    dn = ("NCHW", "OIHW", "NCHW")

    def conv_bf16(x, w, b):
        y = lax.conv_general_dilated(
            x.astype(jnp.bfloat16), w.astype(jnp.bfloat16),
            (1, 1), ((1, 1), (1, 1)), dimension_numbers=dn,
            preferred_element_type=jnp.float32)
        b_q = b.astype(jnp.bfloat16).astype(jnp.float32)
        return y + b_q[None, :, None, None]

    mu = ref.mean(axis=(2, 3), keepdims=True)
    var = ref.var(axis=(2, 3), keepdims=True)                 # biased (InstanceNorm)
    ref_normed = (ref - mu) / jnp.sqrt(var + EPS)
    x = jax.nn.relu(conv_bf16(lr, params["conv_w"], params["conv_b"]))
    gamma = conv_bf16(x, params["gamma_w"], params["gamma_b"])
    beta = conv_bf16(x, params["beta_w"], params["beta_b"])
    lr_mean = lr.mean(axis=(2, 3), keepdims=True)
    lr_std = jnp.std(lr, axis=(2, 3), keepdims=True, ddof=1)  # torch.std (unbiased)
    return ref_normed * (gamma + lr_std) + (beta + lr_mean)


if __name__ == "__main__":
    B, C, H, W = 4, 8, 16, 16  # nf = C = 8, H*W = 256 lanes per image

    key = jax.random.PRNGKey(0)
    k_lr, k_ref, k1, k2, k3, k4, k5, k6 = jax.random.split(key, 8)

    lr = jax.random.normal(k_lr, (B, C, H, W), jnp.float32)
    ref = jax.random.normal(k_ref, (B, C, H, W), jnp.float32)

    params = {
        "conv_w": 0.1 * jax.random.normal(k1, (C, C, 3, 3), jnp.float32),
        "conv_b": 0.1 * jax.random.normal(k2, (C,), jnp.float32),
        "gamma_w": 0.1 * jax.random.normal(k3, (C, C, 3, 3), jnp.float32),
        "gamma_b": 0.1 * jax.random.normal(k4, (C,), jnp.float32),
        "beta_w": 0.1 * jax.random.normal(k5, (C, C, 3, 3), jnp.float32),
        "beta_b": 0.1 * jax.random.normal(k6, (C,), jnp.float32),
    }

    out = jax.block_until_ready(modality_norm(lr, ref, params))
    exp = jax.block_until_ready(reference(lr, ref, params))

    assert out.shape == (B, C, H, W)
    max_err = float(jnp.max(jnp.abs(out - exp)))
    # bf16 matmul operands -> tolerance looser than the old pure-f32 check.
    assert max_err < 2e-2, f"max abs error {max_err}"

    print("KERNEL_OK")
</pallas_src>

<mosaic_0001>
module attributes {stable_mosaic.version = 11 : i64} {
  func.func @kernel(%arg0: i32, %arg1: memref<2x8x256xf32, #tpu.memory_space<vmem>>, %arg2: memref<2x8x256xf32, #tpu.memory_space<vmem>>, %arg3: memref<9x512xf32, #tpu.memory_space<vmem>>, %arg4: memref<8x73xbf16, #tpu.memory_space<vmem>>, %arg5: memref<16x73xbf16, #tpu.memory_space<vmem>>, %arg6: memref<2x8x256xf32, #tpu.memory_space<vmem>>, %arg7: memref<73x512xf32, #tpu.memory_space<vmem>>) attributes {dimension_semantics = [#tpu.dimension_semantics<parallel>], iteration_bounds = array<i64: 2>, scalar_prefetch = 0 : i64, scratch_operands = 1 : i64, tpu.core_type = #tpu.core_type<tc>, window_params = [{transform_indices = @transform_0, window_bounds = array<i64: 2, 8, 256>}, {transform_indices = @transform_1, window_bounds = array<i64: 2, 8, 256>}, {pipeline_mode = #tpu.pipeline_mode<synchronous>, transform_indices = @transform_2, window_bounds = array<i64: 9, 512>}, {pipeline_mode = #tpu.pipeline_mode<synchronous>, transform_indices = @transform_3, window_bounds = array<i64: 8, 73>}, {pipeline_mode = #tpu.pipeline_mode<synchronous>, transform_indices = @transform_4, window_bounds = array<i64: 16, 73>}, {transform_indices = @transform_5, window_bounds = array<i64: 2, 8, 256>}]} {
    %c0 = arith.constant 0 : index
    %c0_0 = arith.constant 0 : index
    %c0_1 = arith.constant 0 : index
    %0 = vector.load %arg2[%c0, %c0_0, %c0_1] : memref<2x8x256xf32, #tpu.memory_space<vmem>>, vector<1x8x256xf32>
    %1 = vector.shape_cast %0 : vector<1x8x256xf32> to vector<8x256xf32>
    %cst = arith.constant dense<0.000000e+00> : vector<8xf32>
    %2 = vector.multi_reduction <add>, %1, %cst [1] : vector<8x256xf32> to vector<8xf32>
    %3 = vector.shape_cast %2 : vector<8xf32> to vector<8x1xf32>
    %cst_2 = arith.constant 2.560000e+02 : f32
    %4 = vector.broadcast %cst_2 : f32 to vector<8x1xf32>
    %5 = arith.divf %3, %4 : vector<8x1xf32>
    %6 = vector.broadcast %5 : vector<8x1xf32> to vector<8x256xf32>
    %7 = arith.subf %1, %6 : vector<8x256xf32>
    %8 = arith.mulf %7, %7 : vector<8x256xf32>
    %cst_3 = arith.constant dense<0.000000e+00> : vector<8xf32>
    %9 = vector.multi_reduction <add>, %8, %cst_3 [1] : vector<8x256xf32> to vector<8xf32>
    %10 = vector.shape_cast %9 : vector<8xf32> to vector<8x1xf32>
    %cst_4 = arith.constant 2.560000e+02 : f32
    %11 = vector.broadcast %cst_4 : f32 to vector<8x1xf32>
    %12 = arith.divf %10, %11 : vector<8x1xf32>
    %13 = vector.broadcast %5 : vector<8x1xf32> to vector<8x256xf32>
    %14 = arith.subf %1, %13 : vector<8x256xf32>
    %cst_5 = arith.constant 9.99999974E-6 : f32
    %15 = vector.broadcast %cst_5 : f32 to vector<8x1xf32>
    %16 = arith.addf %12, %15 : vector<8x1xf32>
    %17 = math.rsqrt %16 : vector<8x1xf32>
    %18 = vector.broadcast %17 : vector<8x1xf32> to vector<8x256xf32>
    %19 = arith.mulf %14, %18 : vector<8x256xf32>
    %c0_6 = arith.constant 0 : index
    %c0_7 = arith.constant 0 : index
    %c0_8 = arith.constant 0 : index
    %20 = vector.load %arg1[%c0_6, %c0_7, %c0_8] : memref<2x8x256xf32, #tpu.memory_space<vmem>>, vector<1x8x256xf32>
    %21 = vector.shape_cast %20 : vector<1x8x256xf32> to vector<8x256xf32>
    %cst_9 = arith.constant dense<0.000000e+00> : vector<8xf32>
    %22 = vector.multi_reduction <add>, %21, %cst_9 [1] : vector<8x256xf32> to vector<8xf32>
    %23 = vector.shape_cast %22 : vector<8xf32> to vector<8x1xf32>
    %cst_10 = arith.constant 2.560000e+02 : f32
    %24 = vector.broadcast %cst_10 : f32 to vector<8x1xf32>
    %25 = arith.divf %23, %24 : vector<8x1xf32>
    %26 = vector.broadcast %25 : vector<8x1xf32> to vector<8x256xf32>
    %27 = arith.subf %21, %26 : vector<8x256xf32>
    %28 = arith.mulf %27, %27 : vector<8x256xf32>
    %cst_11 = arith.constant dense<0.000000e+00> : vector<8xf32>
    %29 = vector.multi_reduction <add>, %28, %cst_11 [1] : vector<8x256xf32> to vector<8xf32>
    %30 = vector.shape_cast %29 : vector<8xf32> to vector<8x1xf32>
    %cst_12 = arith.constant 2.550000e+02 : f32
    %31 = vector.broadcast %cst_12 : f32 to vector<8x1xf32>
    %32 = arith.divf %30, %31 : vector<8x1xf32>
    %33 = math.sqrt %32 : vector<8x1xf32>
    %c1 = arith.constant 1 : index
    %c0_13 = arith.constant 0 : index
    %c0_14 = arith.constant 0 : index
    %34 = vector.load %arg2[%c1, %c0_13, %c0_14] : memref<2x8x256xf32, #tpu.memory_space<vmem>>, vector<1x8x256xf32>
    %35 = vector.shape_cast %34 : vector<1x8x256xf32> to vector<8x256xf32>
    %cst_15 = arith.constant dense<0.000000e+00> : vector<8xf32>
    %36 = vector.multi_reduction <add>, %35, %cst_15 [1] : vector<8x256xf32> to vector<8xf32>
    %37 = vector.shape_cast %36 : vector<8xf32> to vector<8x1xf32>
    %cst_16 = arith.constant 2.560000e+02 : f32
    %38 = vector.broadcast %cst_16 : f32 to vector<8x1xf32>
    %39 = arith.divf %37, %38 : vector<8x1xf32>
    %40 = vector.broadcast %39 : vector<8x1xf32> to vector<8x256xf32>
    %41 = arith.subf %35, %40 : vector<8x256xf32>
    %42 = arith.mulf %41, %41 : vector<8x256xf32>
    %cst_17 = arith.constant dense<0.000000e+00> : vector<8xf32>
    %43 = vector.multi_reduction <add>, %42, %cst_17 [1] : vector<8x256xf32> to vector<8xf32>
    %44 = vector.shape_cast %43 : vector<8xf32> to vector<8x1xf32>
    %cst_18 = arith.constant 2.560000e+02 : f32
    %45 = vector.broadcast %cst_18 : f32 to vector<8x1xf32>
    %46 = arith.divf %44, %45 : vector<8x1xf32>
    %47 = vector.broadcast %39 : vector<8x1xf32> to vector<8x256xf32>
    %48 = arith.subf %35, %47 : vector<8x256xf32>
    %cst_19 = arith.constant 9.99999974E-6 : f32
    %49 = vector.broadcast %cst_19 : f32 to vector<8x1xf32>
    %50 = arith.addf %46, %49 : vector<8x1xf32>
    %51 = math.rsqrt %50 : vector<8x1xf32>
    %52 = vector.broadcast %51 : vector<8x1xf32> to vector<8x256xf32>
    %53 = arith.mulf %48, %52 : vector<8x256xf32>
    %c1_20 = arith.constant 1 : index
    %c0_21 = arith.constant 0 : index
    %c0_22 = arith.constant 0 : index
    %54 = vector.load %arg1[%c1_20, %c0_21, %c0_22] : memref<2x8x256xf32, #tpu.memory_space<vmem>>, vector<1x8x256xf32>
    %55 = vector.shape_cast %54 : vector<1x8x256xf32> to vector<8x256xf32>
    %cst_23 = arith.constant dense<0.000000e+00> : vector<8xf32>
    %56 = vector.multi_reduction <add>, %55, %cst_23 [1] : vector<8x256xf32> to vector<8xf32>
    %57 = vector.shape_cast %56 : vector<8xf32> to vector<8x1xf32>
    %cst_24 = arith.constant 2.560000e+02 : f32
    %58 = vector.broadcast %cst_24 : f32 to vector<8x1xf32>
    %59 = arith.divf %57, %58 : vector<8x1xf32>
    %60 = vector.broadcast %59 : vector<8x1xf32> to vector<8x256xf32>
    %61 = arith.subf %55, %60 : vector<8x256xf32>
    %62 = arith.mulf %61, %61 : vector<8x256xf32>
    %cst_25 = arith.constant dense<0.000000e+00> : vector<8xf32>
    %63 = vector.multi_reduction <add>, %62, %cst_25 [1] : vector<8x256xf32> to vector<8xf32>
    %64 = vector.shape_cast %63 : vector<8xf32> to vector<8x1xf32>
    %cst_26 = arith.constant 2.550000e+02 : f32
    %65 = vector.broadcast %cst_26 : f32 to vector<8x1xf32>
    %66 = arith.divf %64, %65 : vector<8x1xf32>
    %67 = math.sqrt %66 : vector<8x1xf32>
    %68 = tpu.concatenate %21, %55 in 1 : vector<8x256xf32>, vector<8x256xf32> -> vector<8x512xf32>
    %c0_27 = arith.constant 0 : index
    %c0_28 = arith.constant 0 : index
    %69 = vector.load %arg3[%c0_27, %c0_28] : memref<9x512xf32, #tpu.memory_space<vmem>>, vector<9x512xf32>
    %70 = vector.extract_strided_slice %69 {offsets = [0, 0], sizes = [1, 512], strides = [1, 1]} : vector<9x512xf32> to vector<1x512xf32>
    %71 = vector.shape_cast %70 : vector<1x512xf32> to vector<1x512xf32>
    %72 = vector.broadcast %71 : vector<1x512xf32> to vector<8x512xf32>
    %73 = vector.extract_strided_slice %69 {offsets = [1, 0], sizes = [1, 512], strides = [1, 1]} : vector<9x512xf32> to vector<1x512xf32>
    %74 = vector.shape_cast %73 : vector<1x512xf32> to vector<1x512xf32>
    %75 = vector.broadcast %74 : vector<1x512xf32> to vector<8x512xf32>
    %76 = vector.extract_strided_slice %69 {offsets = [2, 0], sizes = [1, 512], strides = [1, 1]} : vector<9x512xf32> to vector<1x512xf32>
    %77 = vector.shape_cast %76 : vector<1x512xf32> to vector<1x512xf32>
    %78 = vector.broadcast %77 : vector<1x512xf32> to vector<8x512xf32>
    %79 = vector.extract_strided_slice %69 {offsets = [3, 0], sizes = [1, 512], strides = [1, 1]} : vector<9x512xf32> to vector<1x512xf32>
    %80 = vector.shape_cast %79 : vector<1x512xf32> to vector<1x512xf32>
    %81 = vector.broadcast %80 : vector<1x512xf32> to vector<8x512xf32>
    %82 = vector.extract_strided_slice %69 {offsets = [5, 0], sizes = [1, 512], strides = [1, 1]} : vector<9x512xf32> to vector<1x512xf32>
    %83 = vector.shape_cast %82 : vector<1x512xf32> to vector<1x512xf32>
    %84 = vector.broadcast %83 : vector<1x512xf32> to vector<8x512xf32>
    %85 = vector.extract_strided_slice %69 {offsets = [6, 0], sizes = [1, 512], strides = [1, 1]} : vector<9x512xf32> to vector<1x512xf32>
    %86 = vector.shape_cast %85 : vector<1x512xf32> to vector<1x512xf32>
    %87 = vector.broadcast %86 : vector<1x512xf32> to vector<8x512xf32>
    %88 = vector.extract_strided_slice %69 {offsets = [7, 0], sizes = [1, 512], strides = [1, 1]} : vector<9x512xf32> to vector<1x512xf32>
    %89 = vector.shape_cast %88 : vector<1x512xf32> to vector<1x512xf32>
    %90 = vector.broadcast %89 : vector<1x512xf32> to vector<8x512xf32>
    %91 = vector.extract_strided_slice %69 {offsets = [8, 0], sizes = [1, 512], strides = [1, 1]} : vector<9x512xf32> to vector<1x512xf32>
    %92 = vector.shape_cast %91 : vector<1x512xf32> to vector<1x512xf32>
    %93 = vector.broadcast %92 : vector<1x512xf32> to vector<8x512xf32>
    %cst_29 = arith.constant 1.000000e+00 : f32
    %94 = vector.broadcast %cst_29 : f32 to vector<1x512xf32>
    %c72 = arith.constant 72 : index
    %c0_30 = arith.constant 0 : index
    %95 = vector.load %arg7[%c72, %c0_30] : memref<73x512xf32, #tpu.memory_space<vmem>>, vector<1x512xf32>
    tpu.vector_store %arg7[%c72, %c0_30], %94 {strides = array<i32>} : memref<73x512xf32, #tpu.memory_space<vmem>>, vector<1x512xf32>,
    %c17_i32 = arith.constant 17 : i32
    %96 = tpu.dynamic_rotate %68 by %c17_i32 dim 1 : vector<8x512xf32>, i32 -> vector<8x512xf32>
    %97 = arith.mulf %96, %72 : vector<8x512xf32>
    %c0_31 = arith.constant 0 : index
    %c0_32 = arith.constant 0 : index
    %98 = vector.load %arg7[%c0_31, %c0_32] : memref<73x512xf32, #tpu.memory_space<vmem>>, vector<8x512xf32>
    tpu.vector_store %arg7[%c0_31, %c0_32], %97 {strides = array<i32>} : memref<73x512xf32, #tpu.memory_space<vmem>>, vector<8x512xf32>,
    %c16_i32 = arith.constant 16 : i32
    %99 = tpu.dynamic_rotate %68 by %c16_i32 dim 1 : vector<8x512xf32>, i32 -> vector<8x512xf32>
    %100 = arith.mulf %99, %75 : vector<8x512xf32>
    %c8 = arith.constant 8 : index
    %c0_33 = arith.constant 0 : index
    %101 = vector.load %arg7[%c8, %c0_33] : memref<73x512xf32, #tpu.memory_space<vmem>>, vector<8x512xf32>
    tpu.vector_store %arg7[%c8, %c0_33], %100 {strides = array<i32>} : memref<73x512xf32, #tpu.memory_space<vmem>>, vector<8x512xf32>,
    %c15_i32 = arith.constant 15 : i32
    %102 = tpu.dynamic_rotate %68 by %c15_i32 dim 1 : vector<8x512xf32>, i32 -> vector<8x512xf32>
    %103 = arith.mulf %102, %78 : vector<8x512xf32>
    %c16 = arith.constant 16 : index
    %c0_34 = arith.constant 0 : index
    %104 = vector.load %arg7[%c16, %c0_34] : memref<73x512xf32, #tpu.memory_space<vmem>>, vector<8x512xf32>
    tpu.vector_store %arg7[%c16, %c0_34], %103 {strides = array<i32>} : memref<73x512xf32, #tpu.memory_space<vmem>>, vector<8x512xf32>,
    %c1_i32 = arith.constant 1 : i32
    %105 = tpu.dynamic_rotate %68 by %c1_i32 dim 1 : vector<8x512xf32>, i32 -> vector<8x512xf32>
    %106 = arith.mulf %105, %81 : vector<8x512xf32>
    %c24 = arith.constant 24 : index
    %c0_35 = arith.constant 0 : index
    %107 = vector.load %arg7[%c24, %c0_35] : memref<73x512xf32, #tpu.memory_space<vmem>>, vector<8x512xf32>
    tpu.vector_store %arg7[%c24, %c0_35], %106 {strides = array<i32>} : memref<73x512xf32, #tpu.memory_space<vmem>>, vector<8x512xf32>,
    %c32 = arith.constant 32 : index
    %c0_36 = arith.constant 0 : index
    %108 = vector.load %arg7[%c32, %c0_36] : memref<73x512xf32, #tpu.memory_space<vmem>>, vector<8x512xf32>
    tpu.vector_store %arg7[%c32, %c0_36], %68 {strides = array<i32>} : memref<73x512xf32, #tpu.memory_space<vmem>>, vector<8x512xf32>,
    %c511_i32 = arith.constant 511 : i32
    %109 = tpu.dynamic_rotate %68 by %c511_i32 dim 1 : vector<8x512xf32>, i32 -> vector<8x512xf32>
    %110 = arith.mulf %109, %84 : vector<8x512xf32>
    %c40 = arith.constant 40 : index
    %c0_37 = arith.constant 0 : index
    %111 = vector.load %arg7[%c40, %c0_37] : memref<73x512xf32, #tpu.memory_space<vmem>>, vector<8x512xf32>
    tpu.vector_store %arg7[%c40, %c0_37], %110 {strides = array<i32>} : memref<73x512xf32, #tpu.memory_space<vmem>>, vector<8x512xf32>,
    %c497_i32 = arith.constant 497 : i32
    %112 = tpu.dynamic_rotate %68 by %c497_i32 dim 1 : vector<8x512xf32>, i32 -> vector<8x512xf32>
    %113 = arith.mulf %112, %87 : vector<8x512xf32>
    %c48 = arith.constant 48 : index
    %c0_38 = arith.constant 0 : index
    %114 = vector.load %arg7[%c48, %c0_38] : memref<73x512xf32, #tpu.memory_space<vmem>>, vector<8x512xf32>
    tpu.vector_store %arg7[%c48, %c0_38], %113 {strides = array<i32>} : memref<73x512xf32, #tpu.memory_space<vmem>>, vector<8x512xf32>,
    %c496_i32 = arith.constant 496 : i32
    %115 = tpu.dynamic_rotate %68 by %c496_i32 dim 1 : vector<8x512xf32>, i32 -> vector<8x512xf32>
    %116 = arith.mulf %115, %90 : vector<8x512xf32>
    %c56 = arith.constant 56 : index
    %c0_39 = arith.constant 0 : index
    %117 = vector.load %arg7[%c56, %c0_39] : memref<73x512xf32, #tpu.memory_space<vmem>>, vector<8x512xf32>
    tpu.vector_store %arg7[%c56, %c0_39], %116 {strides = array<i32>} : memref<73x512xf32, #tpu.memory_space<vmem>>, vector<8x512xf32>,
    %c495_i32 = arith.constant 495 : i32
    %118 = tpu.dynamic_rotate %68 by %c495_i32 dim 1 : vector<8x512xf32>, i32 -> vector<8x512xf32>
    %119 = arith.mulf %118, %93 : vector<8x512xf32>
    %c64 = arith.constant 64 : index
    %c0_40 = arith.constant 0 : index
    %120 = vector.load %arg7[%c64, %c0_40] : memref<73x512xf32, #tpu.memory_space<vmem>>, vector<8x512xf32>
    tpu.vector_store %arg7[%c64, %c0_40], %119 {strides = array<i32>} : memref<73x512xf32, #tpu.memory_space<vmem>>, vector<8x512xf32>,
    %c0_41 = arith.constant 0 : index
    %c0_42 = arith.constant 0 : index
    %121 = vector.load %arg4[%c0_41, %c0_42] : memref<8x73xbf16, #tpu.memory_space<vmem>>, vector<8x73xbf16>
    %c0_43 = arith.constant 0 : index
    %c0_44 = arith.constant 0 : index
    %122 = vector.load %arg7[%c0_43, %c0_44] : memref<73x512xf32, #tpu.memory_space<vmem>>, vector<73x512xf32>
    %123 = arith.truncf %122 : vector<73x512xf32> to vector<73x512xbf16>
    %cst_45 = arith.constant dense<0.000000e+00> : vector<8x512xf32>
    %124 = tpu.matmul %121, %123, %cst_45 {dimension_numbers = #tpu.dot_dimension_numbers<[1], [0], [0], [1], [0, 0, 1, 1], [], []>} : vector<8x73xbf16>, vector<73x512xbf16>, vector<8x512xf32> -> vector<8x512xf32>
    %cst_46 = arith.constant 0.000000e+00 : f32
    %125 = vector.broadcast %cst_46 : f32 to vector<8x512xf32>
    %126 = arith.maximumf %124, %125 : vector<8x512xf32>
    %c17_i32_47 = arith.constant 17 : i32
    %127 = tpu.dynamic_rotate %126 by %c17_i32_47 dim 1 : vector<8x512xf32>, i32 -> vector<8x512xf32>
    %128 = arith.mulf %127, %72 : vector<8x512xf32>
    %c0_48 = arith.constant 0 : index
    %c0_49 = arith.constant 0 : index
    %129 = vector.load %arg7[%c0_48, %c0_49] : memref<73x512xf32, #tpu.memory_space<vmem>>, vector<8x512xf32>
    tpu.vector_store %arg7[%c0_48, %c0_49], %128 {strides = array<i32>} : memref<73x512xf32, #tpu.memory_space<vmem>>, vector<8x512xf32>,
    %c16_i32_50 = arith.constant 16 : i32
    %130 = tpu.dynamic_rotate %126 by %c16_i32_50 dim 1 : vector<8x512xf32>, i32 -> vector<8x512xf32>
    %131 = arith.mulf %130, %75 : vector<8x512xf32>
    %c8_51 = arith.constant 8 : index
    %c0_52 = arith.constant 0 : index
    %132 = vector.load %arg7[%c8_51, %c0_52] : memref<73x512xf32, #tpu.memory_space<vmem>>, vector<8x512xf32>
    tpu.vector_store %arg7[%c8_51, %c0_52], %131 {strides = array<i32>} : memref<73x512xf32, #tpu.memory_space<vmem>>, vector<8x512xf32>,
    %c15_i32_53 = arith.constant 15 : i32
    %133 = tpu.dynamic_rotate %126 by %c15_i32_53 dim 1 : vector<8x512xf32>, i32 -> vector<8x512xf32>
    %134 = arith.mulf %133, %78 : vector<8x512xf32>
    %c16_54 = arith.constant 16 : index
    %c0_55 = arith.constant 0 : index
    %135 = vector.load %arg7[%c16_54, %c0_55] : memref<73x512xf32, #tpu.memory_space<vmem>>, vector<8x512xf32>
    tpu.vector_store %arg7[%c16_54, %c0_55], %134 {strides = array<i32>} : memref<73x512xf32, #tpu.memory_space<vmem>>, vector<8x512xf32>,
    %c1_i32_56 = arith.constant 1 : i32
    %136 = tpu.dynamic_rotate %126 by %c1_i32_56 dim 1 : vector<8x512xf32>, i32 -> vector<8x512xf32>
    %137 = arith.mulf %136, %81 : vector<8x512xf32>
    %c24_57 = arith.constant 24 : index
    %c0_58 = arith.constant 0 : index
    %138 = vector.load %arg7[%c24_57, %c0_58] : memref<73x512xf32, #tpu.memory_space<vmem>>, vector<8x512xf32>
    tpu.vector_store %arg7[%c24_57, %c0_58], %137 {strides = array<i32>} : memref<73x512xf32, #tpu.memory_space<vmem>>, vector<8x512xf32>,
    %c32_59 = arith.constant 32 : index
    %c0_60 = arith.constant 0 : index
    %139 = vector.load %arg7[%c32_59, %c0_60] : memref<73x512xf32, #tpu.memory_space<vmem>>, vector<8x512xf32>
    tpu.vector_store %arg7[%c32_59, %c0_60], %126 {strides = array<i32>} : memref<73x512xf32, #tpu.memory_space<vmem>>, vector<8x512xf32>,
    %c511_i32_61 = arith.constant 511 : i32
    %140 = tpu.dynamic_rotate %126 by %c511_i32_61 dim 1 : vector<8x512xf32>, i32 -> vector<8x512xf32>
    %141 = arith.mulf %140, %84 : vector<8x512xf32>
    %c40_62 = arith.constant 40 : index
    %c0_63 = arith.constant 0 : index
    %142 = vector.load %arg7[%c40_62, %c0_63] : memref<73x512xf32, #tpu.memory_space<vmem>>, vector<8x512xf32>
    tpu.vector_store %arg7[%c40_62, %c0_63], %141 {strides = array<i32>} : memref<73x512xf32, #tpu.memory_space<vmem>>, vector<8x512xf32>,
    %c497_i32_64 = arith.constant 497 : i32
    %143 = tpu.dynamic_rotate %126 by %c497_i32_64 dim 1 : vector<8x512xf32>, i32 -> vector<8x512xf32>
    %144 = arith.mulf %143, %87 : vector<8x512xf32>
    %c48_65 = arith.constant 48 : index
    %c0_66 = arith.constant 0 : index
    %145 = vector.load %arg7[%c48_65, %c0_66] : memref<73x512xf32, #tpu.memory_space<vmem>>, vector<8x512xf32>
    tpu.vector_store %arg7[%c48_65, %c0_66], %144 {strides = array<i32>} : memref<73x512xf32, #tpu.memory_space<vmem>>, vector<8x512xf32>,
    %c496_i32_67 = arith.constant 496 : i32
    %146 = tpu.dynamic_rotate %126 by %c496_i32_67 dim 1 : vector<8x512xf32>, i32 -> vector<8x512xf32>
    %147 = arith.mulf %146, %90 : vector<8x512xf32>
    %c56_68 = arith.constant 56 : index
    %c0_69 = arith.constant 0 : index
    %148 = vector.load %arg7[%c56_68, %c0_69] : memref<73x512xf32, #tpu.memory_space<vmem>>, vector<8x512xf32>
    tpu.vector_store %arg7[%c56_68, %c0_69], %147 {strides = array<i32>} : memref<73x512xf32, #tpu.memory_space<vmem>>, vector<8x512xf32>,
    %c495_i32_70 = arith.constant 495 : i32
    %149 = tpu.dynamic_rotate %126 by %c495_i32_70 dim 1 : vector<8x512xf32>, i32 -> vector<8x512xf32>
    %150 = arith.mulf %149, %93 : vector<8x512xf32>
    %c64_71 = arith.constant 64 : index
    %c0_72 = arith.constant 0 : index
    %151 = vector.load %arg7[%c64_71, %c0_72] : memref<73x512xf32, #tpu.memory_space<vmem>>, vector<8x512xf32>
    tpu.vector_store %arg7[%c64_71, %c0_72], %150 {strides = array<i32>} : memref<73x512xf32, #tpu.memory_space<vmem>>, vector<8x512xf32>,
    %c0_73 = arith.constant 0 : index
    %c0_74 = arith.constant 0 : index
    %152 = vector.load %arg5[%c0_73, %c0_74] : memref<16x73xbf16, #tpu.memory_space<vmem>>, vector<16x73xbf16>
    %c0_75 = arith.constant 0 : index
    %c0_76 = arith.constant 0 : index
    %153 = vector.load %arg7[%c0_75, %c0_76] : memref<73x512xf32, #tpu.memory_space<vmem>>, vector<73x512xf32>
    %154 = arith.truncf %153 : vector<73x512xf32> to vector<73x512xbf16>
    %cst_77 = arith.constant dense<0.000000e+00> : vector<16x512xf32>
    %155 = tpu.matmul %152, %154, %cst_77 {dimension_numbers = #tpu.dot_dimension_numbers<[1], [0], [0], [1], [0, 0, 1, 1], [], []>} : vector<16x73xbf16>, vector<73x512xbf16>, vector<16x512xf32> -> vector<16x512xf32>
    %156 = vector.extract_strided_slice %155 {offsets = [0, 0], sizes = [8, 256], strides = [1, 1]} : vector<16x512xf32> to vector<8x256xf32>
    %157 = vector.broadcast %33 : vector<8x1xf32> to vector<8x256xf32>
    %158 = arith.addf %156, %157 : vector<8x256xf32>
    %159 = vector.extract_strided_slice %155 {offsets = [8, 0], sizes = [8, 256], strides = [1, 1]} : vector<16x512xf32> to vector<8x256xf32>
    %160 = vector.broadcast %25 : vector<8x1xf32> to vector<8x256xf32>
    %161 = arith.addf %159, %160 : vector<8x256xf32>
    %162 = arith.mulf %19, %158 : vector<8x256xf32>
    %163 = arith.addf %162, %161 : vector<8x256xf32>
    %c0_78 = arith.constant 0 : index
    %c0_79 = arith.constant 0 : index
    %c0_80 = arith.constant 0 : index
    %164 = vector.load %arg6[%c0_78, %c0_79, %c0_80] : memref<2x8x256xf32, #tpu.memory_space<vmem>>, vector<1x8x256xf32>
    %165 = vector.shape_cast %164 : vector<1x8x256xf32> to vector<8x256xf32>
    %166 = vector.shape_cast %163 : vector<8x256xf32> to vector<1x8x256xf32>
    tpu.vector_store %arg6[%c0_78, %c0_79, %c0_80], %166 {strides = array<i32>} : memref<2x8x256xf32, #tpu.memory_space<vmem>>, vector<1x8x256xf32>,
    %167 = vector.extract_strided_slice %155 {offsets = [0, 256], sizes = [8, 256], strides = [1, 1]} : vector<16x512xf32> to vector<8x256xf32>
    %168 = vector.broadcast %67 : vector<8x1xf32> to vector<8x256xf32>
    %169 = arith.addf %167, %168 : vector<8x256xf32>
    %170 = vector.extract_strided_slice %155 {offsets = [8, 256], sizes = [8, 256], strides = [1, 1]} : vector<16x512xf32> to vector<8x256xf32>
    %171 = vector.broadcast %59 : vector<8x1xf32> to vector<8x256xf32>
    %172 = arith.addf %170, %171 : vector<8x256xf32>
    %173 = arith.mulf %53, %169 : vector<8x256xf32>
    %174 = arith.addf %173, %172 : vector<8x256xf32>
    %c1_81 = arith.constant 1 : index
    %c0_82 = arith.constant 0 : index
    %c0_83 = arith.constant 0 : index
    %175 = vector.load %arg6[%c1_81, %c0_82, %c0_83] : memref<2x8x256xf32, #tpu.memory_space<vmem>>, vector<1x8x256xf32>
    %176 = vector.shape_cast %175 : vector<1x8x256xf32> to vector<8x256xf32>
    %177 = vector.shape_cast %174 : vector<8x256xf32> to vector<1x8x256xf32>
    tpu.vector_store %arg6[%c1_81, %c0_82, %c0_83], %177 {strides = array<i32>} : memref<2x8x256xf32, #tpu.memory_space<vmem>>, vector<1x8x256xf32>,
    return
  }
  func.func @transform_0(%arg0: i32) -> (i32, i32, i32) {
    %c0_i32 = arith.constant 0 : i32
    %c0_i32_0 = arith.constant 0 : i32
    %c0_i32_1 = arith.constant 0 : i32
    return %arg0, %c0_i32, %c0_i32_0 : i32, i32, i32
  }
  func.func @transform_1(%arg0: i32) -> (i32, i32, i32) {
    %c0_i32 = arith.constant 0 : i32
    %c0_i32_0 = arith.constant 0 : i32
    %c0_i32_1 = arith.constant 0 : i32
    return %arg0, %c0_i32, %c0_i32_0 : i32, i32, i32
  }
  func.func @transform_2(%arg0: i32) -> (i32, i32) {
    %c0_i32 = arith.constant 0 : i32
    %c0_i32_0 = arith.constant 0 : i32
    %c0_i32_1 = arith.constant 0 : i32
    return %c0_i32, %c0_i32_0 : i32, i32
  }
  func.func @transform_3(%arg0: i32) -> (i32, i32) {
    %c0_i32 = arith.constant 0 : i32
    %c0_i32_0 = arith.constant 0 : i32
    %c0_i32_1 = arith.constant 0 : i32
    return %c0_i32, %c0_i32_0 : i32, i32
  }
  func.func @transform_4(%arg0: i32) -> (i32, i32) {
    %c0_i32 = arith.constant 0 : i32
    %c0_i32_0 = arith.constant 0 : i32
    %c0_i32_1 = arith.constant 0 : i32
    return %c0_i32, %c0_i32_0 : i32, i32
  }
  func.func @transform_5(%arg0: i32) -> (i32, i32, i32) {
    %c0_i32 = arith.constant 0 : i32
    %c0_i32_0 = arith.constant 0 : i32
    %c0_i32_1 = arith.constant 0 : i32
    return %arg0, %c0_i32, %c0_i32_0 : i32, i32, i32
  }
}

</mosaic_0001>

<bundles_post_ra>
// kernel: tpu_custom_call.1
= control target key start
LH: loop header
LB: loop body
LE: loop exit
PB: predicated region body
PF: predicated region fallthrough
CT: control target
= control target key end

     0   :  { %s2550_s0 = inlined_call_operand.hbm [shape: f32[4,8,256], index: 0, kind: input, shape index: {}]   ;;  %s2551_s1 = inlined_call_operand.hbm [shape: f32[4,8,256], index: 1, kind: input, shape index: {}]   ;;  %s2552_s2 = inlined_call_operand.hbm [shape: f32[9,512], index: 2, kind: input, shape index: {}]   ;;  %s2553_s3 = inlined_call_operand.vmem [shape: bf16[8,73], index: 3, kind: input, shape index: {}]   ;;  %s2554_s4 = inlined_call_operand.hbm [shape: bf16[16,73], index: 4, kind: input, shape index: {}]   ;;  %s2555_s5 = inlined_call_operand.hbm [shape: f32[4,8,256], index: 5, kind: output, shape index: {}]  }
   0x1   :  { %2559 = sst [smem:[#allocation17_spill]] %s2550_s0 }
   0x2   :  { %2560 = sst [smem:[#allocation18_spill]] %s2552_s2 }
   0x3   :  { %10 = vsyncpa [#allocation4], 0 }
   0x4   :  { %12 = vsyncpa [#allocation4 + $0x1], 0 }
   0x5   :  { %13 = vsyncpa [#allocation7], 0 }
   0x6   :  { %15 = vsyncpa [#allocation7 + $0x1], 0 }
   0x7   :  { %16 = vsyncpa [#allocation10], 0 }
   0x8   :  { %17 = vsyncpa [#allocation5], 0 }
   0x9   :  { %19 = vsyncpa [#allocation5 + $0x1], 0  ;;  %s1752_s18 = smov 0   ;;  %s1754_s19 = smov 0  }
   0xa   :  { %s1756_s20 = smov 0   ;;  %s1758_s21 = smov 0  }
   0xb LB: > { %s1773_s22 = sadd.s32 4294967295, %s1697_s21   ;;  %s1367_s23 = sadd.s32 4294967294, %s1697_s21   ;;  %s1697_s21 = sphi %s1758_s21, %s2581_s21   ;;  %s1693_s20 = sphi %s1756_s20, %s2580_s20   ;;  %s1689_s19 = sphi %s1754_s19, %s2579_s19   ;;  %s1685_s18 = sphi %s1752_s18, %s2578_s18  }
   0xc   : > { %p45_p0 = scmp.ne.s32.totalorder %s1689_s19, %s1685_s18  ;;  %p2556_p1 = scmp.eq.s32.totalorder %s1773_s22, 0 }
   0xd   : > { %p164_p3 = scmp.eq.s32.totalorder %s1367_s23, 1  ;;  %p1368_p5 = scmp.ge.s32.totalorder %s1697_s21, 1 }
   0xe   : > { %p1782_p4 = por %p2556_p1, %p45_p0  ;;  %p171_p7 = scmp.lt.s32.totalorder %s1697_s21, 3 }
   0xf   : > { %p1787_p6 = por %p164_p3, %p45_p0  ;;  %s1699_s27 = smov [#allocation8]  }
  0x10   : > { %s2561_s24 = scalar_select %p1782_p4, 1, 0 }
  0x11   : > { %s2562_s25 = scalar_select %p1787_p6, 1, 0 }
  0x12   : > { %p1792_p8 = pnand %p1368_p5, %p171_p7  ;;  %s183_s28 = sshll.u32 %s1699_s27, 4  ;;  %s184_s28 = int_to_ptr.vmem [resolvable:$true] %s183_s28 }
  0x13   : > { %s1700_s30 = smov [#allocation9]   ;;  %s1524_s7 = scalar_lea.vmem %s184_s28, 1024 }
  0x14   : > { %p1427_p9 = pneg %p1792_p8  ;;  %s199_s6 = sshll.u32 %s1700_s30, 4  ;;  %s200_s6 = int_to_ptr.vmem [resolvable:$true] %s199_s6 }
  0x15   : > { %p1525_p13 = scmp.ne.s32.totalorder %s184_s28, %s1524_s7  ;;  %p1532_p5 = scmp.lt.s32.totalorder %s184_s28, %s184_s28 }
  0x16   : > { %p1801_p11 = pnand %p1427_p9, %p2556_p1  ;;  %p1533_p7 = scmp.lt.s32.totalorder %s1524_s7, %s1524_s7 }
  0x18   : > { %p1515_p12 = pneg %p1801_p11  ;;  %p1534_p10 = por %p1533_p7, %p1532_p5 }
  0x1a   : > { %p1527_p0 = pnand %p1525_p13, %p1515_p12 }
  0x1c   : > { %p1528_p3 = pneg %p1527_p0 }
  0x1e   : > { %p1535_p9 = pnand %p1534_p10, %p1528_p3 }
  0x20   : > { %1538 = shalt.err (!%p1535_p9)
}
  0x21   : > { %s1701_s8 = smov 512   ;;  %s1702_s9 = smov 32  }
  0x22   : > { %s2565_s2 = sld [smem:[#allocation18_spill]]  ;;  %s1550_s12 = scalar_lea.vmem %s200_s6, 128 }
  0x23   : > { %p1551_p1 = scmp.ne.s32.totalorder %s200_s6, %s1550_s12  ;;  %p1558_p2 = scmp.lt.s32.totalorder %s200_s6, %s200_s6 }
  0x24   : > { %p1559_p6 = scmp.lt.s32.totalorder %s1550_s12, %s1550_s12 }
  0x25   : > { %p1553_p13 = pnand %p1551_p1, %p1515_p12 }
  0x26   : > { %p1560_p5 = por %p1559_p6, %p1558_p2 }
  0x27   : > { %p1554_p0 = pneg %p1553_p13 }
  0x28   : > { %1430 = dma.hbm_to_vmem [thread:$0]  (!%p1801_p11), %s2565_s2, 1024, %s184_s28, [#allocation7], %s1701_s8, %s1701_s8, %s1702_s9  }
  0x29   : > { %p1561_p10 = pnand %p1560_p5, %p1554_p0 }
  0x2b   : > { %1564 = shalt.err (!%p1561_p10)
}
  0x2c   : > { %s1703_s13 = smov 64   ;;  %s1704_s14 = smov 4  }
  0x2d   : > { %1433 = dma.hbm_to_vmem [thread:$0]  (!%p1801_p11), %s2554_s4, 128, %s200_s6, [#allocation10], %s1703_s13, %s1703_s13, %s1704_s14  }
  0x2e   : > { %s1824_s17 = sadd.s32 1, %s1697_s21   ;;  %s32_s27 = sadd.s32 1, %s1693_s20 }
  0x2f   : > { %s29_s23 = ssub.s32 %s1697_s21, %s1824_s17  ;;  %p39_p2 = scmp.ne.s32.totalorder %s1693_s20, %s1689_s19 }
  0x30   : > { %p30_p1 = scmp.eq.s32.totalorder %s29_s23, 0  ;;  %p40_p6 = scmp.eq.s32.totalorder %s1697_s21, 0 }
  0x31   : > { %p2566_p3 = scmp.eq.s32.totalorder %s1773_s22, 1  ;;  %p1447_p9 = scmp.lt.s32.totalorder %s1697_s21, 2 }
  0x32   : > { %s1833_s28 = scalar_select %p30_p1, %s1693_s20, %s32_s27  }
  0x33   : > { %p41_p12 = por %p40_p6, %p39_p2  ;;  %p1837_p7 = por %p2566_p3, %p39_p2 }
  0x34   : > { %s213_s29 = sand.u32 1, %s1693_s20   ;;  %s1408_s6 = sshll.u32 %s1697_s21, 9 }
  0x35   : > { %s2567_s30 = scalar_select %p1837_p7, 1, 0 }
  0x36   : > { %s1843_s7 = sshll.u32 %s213_s29, 5  ;;  %s2568_s0 = sld [smem:[#allocation17_spill]] }
  0x37   : > { %s217_s11 = scalar_lea.vmem [#allocation3], %s1843_s7  ;;  %p1856_p11 = pnand %p1447_p9, %p41_p12 }
  0x38   : > { %s225_s12 = sshll.u32 %s217_s11, 4  ;;  %s1860_s14 = scalar_lea.sflag [#allocation4], %s213_s29  ;;  %s1854_s12 = int_to_ptr.vmem [resolvable:$true] %s225_s12 }
  0x39   : > { %p1567_p0 = pneg %p1856_p11 }
  0x3c   : > { %s1851_s10 = scalar_lea.hbm %s2568_s0, %s1408_s6  ;;  %s1570_s27 = scalar_lea.hbm %s2568_s0, 1024 }
  0x3d   : > { %s1565_s15 = scalar_lea.hbm %s1851_s10, 512  ;;  %p1571_p1 = scmp.lt.s32.totalorder %s1851_s10, %s2568_s0 }
  0x3e   : > { %p1566_p13 = scmp.ne.s32.totalorder %s1851_s10, %s1565_s15  ;;  %p1572_p2 = scmp.lt.s32.totalorder %s1570_s27, %s1565_s15 }
  0x40   : > { %p1568_p5 = pnand %p1567_p0, %p1566_p13  ;;  %p1573_p6 = por %p1572_p2, %p1571_p1 }
  0x42   : > { %p1569_p10 = pneg %p1568_p5 }
  0x44   : > { %p1574_p12 = pnand %p1573_p6, %p1569_p10 }
  0x46   : > { %1577 = shalt.err (!%p1574_p12)
}
  0x47   : > { %s1578_s29 = scalar_lea.vmem %s1854_s12, 512  ;;  %s1705_s11 = smov [#allocation3]  }
  0x48   : > { %p1579_p3 = scmp.ne.s32.totalorder %s1854_s12, %s1578_s29  ;;  %s1583_s16 = sshll.u32 %s1705_s11, 4  ;;  %s1584_s16 = int_to_ptr.vmem [resolvable:$false] %s1583_s16 }
  0x49   : > { %s1585_s23 = scalar_lea.vmem %s1584_s16, 1024  ;;  %p1586_p5 = scmp.lt.s32.totalorder %s1854_s12, %s1584_s16 }
  0x4a   : > { %p1581_p9 = pnand %p1579_p3, %p1567_p0  ;;  %p1587_p7 = scmp.lt.s32.totalorder %s1585_s23, %s1578_s29 }
  0x4c   : > { %p1582_p13 = pneg %p1581_p9  ;;  %p1588_p4 = por %p1587_p7, %p1586_p5 }
  0x4e   : > { %p1589_p1 = pnand %p1588_p4, %p1582_p13 }
  0x50   : > { %1592 = shalt.err (!%p1589_p1)
}
  0x51   : > { %s1706_s15 = smov 256   ;;  %s1707_s27 = smov 16  }
  0x52   : > { %1437 = dma.hbm_to_vmem [thread:$0]  (!%p1856_p11), %s1851_s10, 512, %s1854_s12, %s1860_s14, %s1706_s15, %s1706_s15, %s1707_s27  }
  0x53   : > { %s1895_s29 = scalar_lea.hbm %s2551_s1, %s1408_s6  ;;  %s239_s11 = scalar_lea.vmem [#allocation6], %s1843_s7 }
  0x54   : > { %s247_s16 = sshll.u32 %s239_s11, 4  ;;  %s235_s23 = sand.u32 1, %s1697_s21   ;;  %s1898_s16 = int_to_ptr.vmem [resolvable:$true] %s247_s16 }
  0x55   : > { %s236_s0 = scalar_lea.sflag [#allocation7], %s235_s23  ;;  %s1593_s2 = scalar_lea.hbm %s1895_s29, 512 }
  0x56   : > { %p1594_p4 = scmp.ne.s32.totalorder %s1895_s29, %s1593_s2  ;;  %s1598_s6 = scalar_lea.hbm %s2551_s1, 1024 }
  0x57   : > { %p1599_p2 = scmp.lt.s32.totalorder %s1895_s29, %s2551_s1  ;;  %p1600_p6 = scmp.lt.s32.totalorder %s1598_s6, %s1593_s2 }
  0x58   : > { %p1596_p7 = pnand %p1594_p4, %p1567_p0 }
  0x59   : > { %p1601_p12 = por %p1600_p6, %p1599_p2 }
  0x5a   : > { %p1597_p10 = pneg %p1596_p7 }
  0x5c   : > { %p1602_p3 = pnand %p1601_p12, %p1597_p10 }
  0x5e   : > { %1605 = shalt.err (!%p1602_p3)
}
  0x5f   : > { %s1606_s7 = scalar_lea.vmem %s1898_s16, 512  ;;  %s1708_s9 = smov [#allocation6]  }
  0x60   : > { %p1607_p9 = scmp.ne.s32.totalorder %s1898_s16, %s1606_s7  ;;  %s1611_s11 = sshll.u32 %s1708_s9, 4  ;;  %s1612_s11 = int_to_ptr.vmem [resolvable:$false] %s1611_s11 }
  0x61   : > { %s1613_s23 = scalar_lea.vmem %s1612_s11, 1024  ;;  %p1614_p1 = scmp.lt.s32.totalorder %s1898_s16, %s1612_s11 }
  0x62   : > { %p1609_p13 = pnand %p1607_p9, %p1567_p0  ;;  %p1615_p4 = scmp.lt.s32.totalorder %s1613_s23, %s1606_s7 }
  0x64   : > { %p1610_p5 = pneg %p1609_p13  ;;  %p1616_p7 = por %p1615_p4, %p1614_p1 }
  0x66   : > { %p1617_p2 = pnand %p1616_p7, %p1610_p5 }
  0x68   : > { %1620 = shalt.err (!%p1617_p2)
}
  0x69   : > { %1440 = dma.hbm_to_vmem [thread:$0]  (!%p1856_p11), %s1895_s29, 512, %s1898_s16, %s236_s0, %s1706_s15, %s1706_s15, %s1707_s27  }
  0x6a   : > { %259 = sbr.rel (%p1792_p8) target bundleno = 924 (0x39c), region = 40  ;;  %s1929_s2 = sand.u32 (!%p1792_p8), 1, %s1689_s19  }
  0x6b   : > { %s1932_s10 = sshll.u32 (!%p1792_p8), %s1929_s2, 5  ;;  %s262_s12 = scalar_lea.sflag (!%p1792_p8), [#allocation4], %s1929_s2 }
  0x6c   : > { %s1936_s13 = scalar_lea.vmem (!%p1792_p8), [#allocation3], %s1932_s10  ;;  %p2570_p0 = scmp.ne.s32.totalorder (!%p1792_p8), %s2561_s24, 0 }
  0x6f   : > { %1664 = dma.done.wait (%p2570_p0), %s262_s12, 512  }
  0x70   : > { %1666 = vsyncadd (%p2570_p0), %s262_s12, 4294966784  ;;  %s270_s0 = sand.u32 1, %s1773_s22   ;;  %s1944_s15 = scalar_lea.vmem [#allocation6], %s1932_s10 }
  0x71   : > { %s271_s26 = scalar_lea.sflag [#allocation7], %s270_s0 }
  0x72   : > { %1668 = dma.done.wait (%p2570_p0), %s271_s26, 512  }
  0x73   : > { %1670 = vsyncadd (%p2570_p0), %s271_s26, 4294966784  ;;  %p2571_p8 = scmp.eq.s32.totalorder %s1773_s22, 0 }
  0x75   : > { %1672 = dma.done.wait (%p2571_p8), [#allocation7], 1024   ;;  %p2572_p11 = pmov %p2571_p8 }
  0x76   : > { %p2573_p10 = pmov %p2571_p8 }
  0x77   : > { %1674 = vsyncadd (%p2572_p11), [#allocation7], 4294966272 }
  0x78   : > { %1676 = dma.done.wait (%p2573_p10), [#allocation10], 128   ;;  %p2574_p6 = pmov %p2571_p8 }
  0x79   : > { %v408_v0 = vlaneseq  ;;  %v1709_v1 = vmov 1.0   ;;  %v1960_v2 = vld [vmem:[%s1936_s13 + $0x10] sm:$0xff]  ;;  %v1963_v3 = vld [vmem:[%s1936_s13] sm:$0xff]  ;;  %s1710_s24 = smov 111   ;;  %v1970_v4 = vld [vmem:[%s1936_s13 + $0x18] sm:$0xff]  ;;  %s1711_s27 = smov 113  }
  0x7a   : > { %1678 = vsyncadd (%p2574_p6), [#allocation10], 4294967168  ;;  %700 = vrot.lane.b32.xlu1 %v1960_v2, %s1710_s24  ;;  %696 = vrot.lane.b32.xlu0 %v1963_v3, %s1710_s24  ;;  %v1973_v5 = vld [vmem:[%s1936_s13 + $0x8] sm:$0xff]  ;;  %s1712_s29 = smov 112   ;;  %s1713_s16 = smov 127   ;;  %v1717_v6 = vmov 0  }
  0x7b   : > { %vm538_vm0 = vcmp.lt.s32.totalorder %v408_v0, 512  ;;  %s1714_s6 = smov 15   ;;  %s1715_s14 = smov 1   ;;  %830 = vmatprep.mubr.bf16.mxu0 %v1717_v6  ;;  %871 = vmatprep.mubr.bf16.mxu1 %v1717_v6  ;;  %v2038_v7 = vand.u32 127, %v408_v0  ;;  %vm782_vm1 = vcmask 1043456   ;;  %vm783_vm3 = vcmask 1044480  }
  0x7c   : > { %541 = vst.msk [vmem:[#allocation2 + $0x120] ss:$8 sm:$0xf] %vm538_vm0, %v1709_v1  ;;  %s1716_s8 = smov 17   ;;  %s1718_s7 = smov 16   ;;  %v1719_v17 = vmov 65535  }
  0x7d   : > { %v2040_v10 = vld [vmem:[#allocation8 + $0x30] ss:$0 sm:$0xff]  ;;  %vm704_vm2 = vcmp.lt.s32.totalorder %v2038_v7, 111  ;;  %v2043_v11 = vld [vmem:[#allocation8 + $0x38] ss:$0 sm:$0xff]  ;;  %v784_v18 = vsel %vm782_vm1, 4294967295, %v1719_v17 }
  0x7e   : > { %702 = vrot.lane.b32.xlu1 %v1970_v4, %s1710_s24  ;;  %698 = vrot.lane.b32.xlu0 %v1973_v5, %s1710_s24  ;;  %v2045_v12 = vld [vmem:[#allocation8 + $0x20] ss:$0 sm:$0xff]  ;;  %v2047_v13 = vld [vmem:[#allocation8 + $0x28] ss:$0 sm:$0xff]  ;;  %v2061_v30 = vsel %vm783_vm3, %v784_v18, 0  ;;  %v2064_v37 = vshrl.u32 %v408_v0, 7 }
  0x7f   : > { %v2070_v44 = vld [vmem:[#allocation8 + $0x18] sm:$0xff]  ;;  %v2072_v45 = vld [vmem:[#allocation8 + $0x8] sm:$0xff]  ;;  %v2076_v48 = vld [vmem:[#allocation8 + $0x10] sm:$0xff]  ;;  %vm683_vm4 = vcmp.lt.s32.totalorder %v2038_v7, 112  ;;  %vm662_vm5 = vcmp.lt.s32.totalorder %v2038_v7, 113  ;;  %vm641_vm6 = vcmp.lt.s32.totalorder %v2038_v7, 127 }
  0x80   : > { %v506_v46 = vsub.s32 7, %v2064_v37  ;;  %v490_v47 = vsub.s32 6, %v2064_v37  ;;  %v2079_v49 = vld [vmem:[#allocation8] sm:$0xff]  ;;  %vm595_vm7 = vcmp.lt.s32.totalorder %v2038_v7, 15  ;;  %vm616_vm8 = vcmp.lt.s32.totalorder %v2038_v7, 1  ;;  %s313_s23 = scalar_lea.vmem [#allocation11], %s1932_s10 }
  0x81   : > { %vm553_vm9 = vcmp.lt.s32.totalorder %v2038_v7, 17  ;;  %vm574_vm10 = vcmp.lt.s32.totalorder %v2038_v7, 16  ;;  %vm778_vm11 = vcmask 596992   ;;  %s1252_s12 = sshll.u32 %s313_s23, 4  ;;  %p2575_p3 = scmp.ne.s32.totalorder %s2567_s30, 0  ;;  %s2501_s12 = int_to_ptr.vmem [resolvable:$true] %s1252_s12 }
  0x82   : > { %656 = vrot.lane.b32.xlu1 %v1973_v5, %s1711_s27  ;;  %654 = vrot.lane.b32.xlu0 %v1963_v3, %s1711_s27  ;;  %v2083_v50 = vrot.slane %v2070_v44, %v490_v47  ;;  %v2086_v51 = vrot.slane %v2072_v45, %v490_v47  ;;  %v2091_v55 = vrot.slane %v2076_v48, %v490_v47 }
  0x83   : > { %v755_v16 = vld [vmem:[#allocation2 + $0x128] sm:$0x1]  ;;  %v757_v23 = vld [vmem:[#allocation2 + $0x138] sm:$0x1]  ;;  %v754_v24 = vld [vmem:[#allocation2 + $0x120] sm:$0x1]  ;;  %v2096_v57 = vrot.slane %v2079_v49, %v506_v46  ;;  %v2101_v59 = vrot.slane %v2070_v44, %v506_v46  ;;  %v2104_v60 = vrot.slane %v2072_v45, %v506_v46  ;;  %v2107_v61 = vrot.slane %v2076_v48, %v506_v46 }
  0x84   : > { %v756_v25 = vld [vmem:[#allocation2 + $0x130] sm:$0x1]  ;;  %v2110_v62 = vrot.slane %v2079_v49, %v490_v47 }
  0x86   : > { %660 = vrot.lane.b32.xlu1 %v1970_v4, %s1711_s27  ;;  %658 = vrot.lane.b32.xlu0 %v1960_v2, %s1711_s27 }
  0x8a   : > { %677 = vrot.lane.b32.xlu1 %v1973_v5, %s1712_s29  ;;  %675 = vrot.lane.b32.xlu0 %v1963_v3, %s1712_s29 }
  0x8e   : > { %681 = vrot.lane.b32.xlu1 %v1970_v4, %s1712_s29  ;;  %679 = vrot.lane.b32.xlu0 %v1960_v2, %s1712_s29 }
  0x92   : > { %635 = vrot.lane.b32.xlu1 %v1973_v5, %s1713_s16  ;;  %633 = vrot.lane.b32.xlu0 %v1963_v3, %s1713_s16 }
  0x96   : > { %639 = vrot.lane.b32.xlu1 %v1970_v4, %s1713_s16  ;;  %637 = vrot.lane.b32.xlu0 %v1960_v2, %s1713_s16 }
  0x9a   : > { %589 = vrot.lane.b32.xlu1 %v1973_v5, %s1714_s6  ;;  %587 = vrot.lane.b32.xlu0 %v1963_v3, %s1714_s6 }
  0x9e   : > { %593 = vrot.lane.b32.xlu1 %v1970_v4, %s1714_s6  ;;  %591 = vrot.lane.b32.xlu0 %v1960_v2, %s1714_s6 }
  0xa2   : > { %610 = vrot.lane.b32.xlu1 %v1973_v5, %s1715_s14  ;;  %608 = vrot.lane.b32.xlu0 %v1963_v3, %s1715_s14 }
  0xa6   : > { %614 = vrot.lane.b32.xlu1 %v1970_v4, %s1715_s14  ;;  %612 = vrot.lane.b32.xlu0 %v1960_v2, %s1715_s14 }
  0xaa   : > { %545 = vrot.lane.b32.xlu1 %v1973_v5, %s1716_s8  ;;  %543 = vrot.lane.b32.xlu0 %v1963_v3, %s1716_s8 }
  0xae   : > { %549 = vrot.lane.b32.xlu1 %v1970_v4, %s1716_s8  ;;  %547 = vrot.lane.b32.xlu0 %v1960_v2, %s1716_s8 }
  0xb2   : > { %568 = vrot.lane.b32.xlu1 %v1973_v5, %s1718_s7  ;;  %566 = vrot.lane.b32.xlu0 %v1963_v3, %s1718_s7 }
  0xb6   : > { %572 = vrot.lane.b32.xlu1 %v1970_v4, %s1718_s7  ;;  %570 = vrot.lane.b32.xlu0 %v1960_v2, %s1718_s7 }
  0xec   : > { %v701_v8 = vpop.permute.xlu1 %700  ;;  %v697_v9 = vpop.permute.xlu0 %696 }
  0xf0   : > { %v703_v14 = vpop.permute.xlu1 %702  ;;  %v699_v15 = vpop.permute.xlu0 %698 }
  0xf1   : > { %v705_v19 = vsel %vm704_vm2, %v701_v8, %v703_v14  ;;  %v708_v20 = vsel %vm704_vm2, %v703_v14, %v697_v9  ;;  %v706_v21 = vsel %vm704_vm2, %v699_v15, %v701_v8  ;;  %v707_v22 = vsel %vm704_vm2, %v697_v9, %v699_v15 }
  0xf2   : > { %v711_v26 = vmul.f32 %v2040_v10, %v705_v19  ;;  %v712_v27 = vmul.f32 %v2043_v11, %v708_v20  ;;  %v709_v28 = vmul.f32 %v2045_v12, %v707_v22  ;;  %v710_v29 = vmul.f32 %v2047_v13, %v706_v21 }
  0xf3   : > { %v474_v15 = vsub.s32 5, %v2064_v37 }
  0xf4   : > { %v657_v31 = vpop.permute.xlu1 %656  ;;  %v655_v32 = vpop.permute.xlu0 %654  ;;  %v775_v33 = vpack.c.bf16 %v755_v16, %v710_v29  ;;  %v777_v34 = vpack.c.bf16 %v757_v23, %v712_v27  ;;  %v774_v35 = vpack.c.bf16 %v754_v24, %v709_v28  ;;  %v776_v36 = vpack.c.bf16 %v756_v25, %v711_v26 }
  0xf5   : > { %v665_v0 = vsel %vm662_vm5, %v655_v32, %v657_v31 }
  0xf6   : > { %v790_v38 = vand.u32 %v2061_v30, %v775_v33  ;;  %v796_v39 = vand.u32 %v2061_v30, %v777_v34  ;;  %v787_v40 = vand.u32 %v2061_v30, %v774_v35  ;;  %v793_v41 = vand.u32 %v2061_v30, %v776_v36 }
  0xf7   : > { %v667_v24 = vmul.f32 %v665_v0, %v2110_v62  ;;  %v2141_v35 = vrot.slane %v2072_v45, %v474_v15  ;;  %v2144_v36 = vrot.slane %v2076_v48, %v474_v15 }
  0xf8   : > { %v661_v42 = vpop.permute.xlu1 %660  ;;  %v659_v43 = vpop.permute.xlu0 %658  ;;  %804 = vmatprep.subr.bf16.mxu0 %v790_v38  ;;  %845 = vmatprep.subr.bf16.mxu1 %v796_v39 }
  0xf9   : > { %805 = vmatpush1.bf16.msra.mxu0 %v787_v40  ;;  %846 = vmatpush1.bf16.msra.mxu1 %v793_v41  ;;  %v666_v54 = vsel %vm662_vm5, %v661_v42, %v655_v32  ;;  %v664_v56 = vsel %vm662_vm5, %v657_v31, %v659_v43  ;;  %v663_v63 = vsel %vm662_vm5, %v659_v43, %v661_v42 }
  0xfa   : > { %v670_v1 = vmul.f32 %v666_v54, %v2083_v50  ;;  %v668_v8 = vmul.f32 %v664_v56, %v2086_v51  ;;  %v669_v20 = vmul.f32 %v663_v63, %v2091_v55  ;;  %v2133_v31 = vrot.slane %v2079_v49, %v474_v15 }
  0xfb   : > { %v2136_v32 = vrot.slane %v2070_v44, %v474_v15 }
  0xfc   : > { %v678_v52 = vpop.permute.xlu1 %677  ;;  %v676_v53 = vpop.permute.xlu0 %675 }
  0xfd   : > { %v686_v58 = vsel %vm683_vm4, %v676_v53, %v678_v52 }
  0xfe   : > { %v688_v16 = vmul.f32 %v686_v58, %v2096_v57 }
 0x100   : > { %v682_v9 = vpop.permute.xlu1 %681  ;;  %v680_v14 = vpop.permute.xlu0 %679  ;;  %v770_v33 = vpack.c.bf16 %v688_v16, %v667_v24 }
 0x101   : > { %v687_v17 = vsel %vm683_vm4, %v682_v9, %v676_v53  ;;  %v684_v18 = vsel %vm683_vm4, %v680_v14, %v682_v9  ;;  %v685_v19 = vsel %vm683_vm4, %v678_v52, %v680_v14 }
 0x102   : > { %v691_v21 = vmul.f32 %v687_v17, %v2101_v59  ;;  %v689_v22 = vmul.f32 %v685_v19, %v2104_v60  ;;  %v690_v23 = vmul.f32 %v684_v18, %v2107_v61 }
 0x104   : > { %v636_v25 = vpop.permute.xlu1 %635  ;;  %v634_v26 = vpop.permute.xlu0 %633  ;;  %v771_v27 = vpack.c.bf16 %v689_v22, %v668_v8  ;;  %v773_v28 = vpack.c.bf16 %v691_v21, %v670_v1  ;;  %v772_v29 = vpack.c.bf16 %v690_v23, %v669_v20  ;;  %v442_v1 = vsub.s32 2, %v2064_v37 }
 0x105   : > { %v644_v34 = vsel %vm641_vm6, %v634_v26, %v636_v25  ;;  %v458_v8 = vsub.s32 3, %v2064_v37 }
 0x106   : > { %806 = vmatprep.subr.bf16.mxu0 %v771_v27  ;;  %847 = vmatprep.subr.bf16.mxu1 %v773_v28  ;;  %v646_v40 = vmul.f32 %v644_v34, %v2133_v31  ;;  %v2164_v15 = vrot.slane %v2072_v45, %v442_v1  ;;  %v2173_v18 = vrot.slane %v2079_v49, %v442_v1 }
 0x107   : > { %807 = vmatpush1.bf16.msra.mxu0 %v770_v33  ;;  %848 = vmatpush1.bf16.msra.mxu1 %v772_v29  ;;  %v2167_v16 = vrot.slane %v2072_v45, %v458_v8  ;;  %v2176_v19 = vrot.slane %v2076_v48, %v442_v1  ;;  %v2179_v20 = vrot.slane %v2070_v44, %v442_v1 }
 0x108   : > { %v640_v38 = vpop.permute.xlu1 %639  ;;  %v638_v39 = vpop.permute.xlu0 %637  ;;  %v766_v0 = vpack.c.bf16 %v646_v40, %v1963_v3  ;;  %v2196_v33 = vrot.slane %v2070_v44, %v458_v8 }
 0x109   : > { %v645_v41 = vsel %vm641_vm6, %v640_v38, %v634_v26  ;;  %v642_v42 = vsel %vm641_vm6, %v638_v39, %v640_v38  ;;  %v643_v43 = vsel %vm641_vm6, %v636_v25, %v638_v39  ;;  %v2186_v25 = vrot.slane %v2079_v49, %v458_v8 }
 0x10a   : > { %v649_v46 = vmul.f32 %v645_v41, %v2136_v32  ;;  %v647_v47 = vmul.f32 %v643_v43, %v2141_v35  ;;  %v648_v52 = vmul.f32 %v642_v42, %v2144_v36  ;;  %v2189_v26 = vrot.slane %v2076_v48, %v458_v8 }
 0x10c   : > { %v590_v53 = vpop.permute.xlu1 %589  ;;  %v588_v54 = vpop.permute.xlu0 %587  ;;  %v767_v56 = vpack.c.bf16 %v647_v47, %v1973_v5  ;;  %v769_v58 = vpack.c.bf16 %v649_v46, %v1970_v4  ;;  %v768_v63 = vpack.c.bf16 %v648_v52, %v1960_v2 }
 0x10d   : > { %v598_v17 = vsel %vm595_vm7, %v588_v54, %v590_v53 }
 0x10e   : > { %808 = vmatprep.subr.bf16.mxu0 %v767_v56  ;;  %849 = vmatprep.subr.bf16.mxu1 %v769_v58  ;;  %v601_v27 = vmul.f32 %v598_v17, %v2164_v15 }
 0x10f   : > { %809 = vmatpush1.bf16.msra.mxu0 %v766_v0  ;;  %850 = vmatpush1.bf16.msra.mxu1 %v768_v63 }
 0x110   : > { %v594_v9 = vpop.permute.xlu1 %593  ;;  %v592_v14 = vpop.permute.xlu0 %591 }
 0x111   : > { %v599_v23 = vsel %vm595_vm7, %v594_v9, %v588_v54  ;;  %v597_v28 = vsel %vm595_vm7, %v590_v53, %v592_v14  ;;  %v596_v34 = vsel %vm595_vm7, %v592_v14, %v594_v9  ;;  %v410_v9 = vsub.s32 0, %v2064_v37 }
 0x112   : > { %v600_v38 = vmul.f32 %v599_v23, %v2173_v18  ;;  %v602_v42 = vmul.f32 %v597_v28, %v2176_v19  ;;  %v603_v52 = vmul.f32 %v596_v34, %v2179_v20  ;;  %v426_v14 = vsub.s32 1, %v2064_v37 }
 0x113   : > { %v2225_v37 = vrot.slane %v2079_v49, %v410_v9  ;;  %v2231_v28 = vrot.slane %v2070_v44, %v410_v9 }
 0x114   : > { %v611_v21 = vpop.permute.xlu1 %610  ;;  %v609_v22 = vpop.permute.xlu0 %608  ;;  %v2219_v23 = vrot.slane %v2072_v45, %v426_v14 }
 0x115   : > { %v619_v24 = vsel %vm616_vm8, %v609_v22, %v611_v21 }
 0x116   : > { %v622_v29 = vmul.f32 %v619_v24, %v2167_v16 }
 0x118   : > { %v615_v39 = vpop.permute.xlu1 %614  ;;  %v613_v40 = vpop.permute.xlu0 %612  ;;  %v763_v41 = vpack.c.bf16 %v622_v29, %v601_v27  ;;  %v2228_v27 = vrot.slane %v2076_v48, %v410_v9 }
 0x119   : > { %v620_v43 = vsel %vm616_vm8, %v615_v39, %v609_v22  ;;  %v617_v46 = vsel %vm616_vm8, %v613_v40, %v615_v39  ;;  %v618_v47 = vsel %vm616_vm8, %v611_v21, %v613_v40  ;;  %v2216_v22 = vrot.slane %v2072_v45, %v410_v9 }
 0x11a   : > { %v621_v53 = vmul.f32 %v620_v43, %v2186_v25  ;;  %v623_v54 = vmul.f32 %v618_v47, %v2189_v26  ;;  %v624_v56 = vmul.f32 %v617_v46, %v2196_v33  ;;  %810 = vmatprep.subr.bf16.mxu0 %v763_v41  ;;  %v2238_v39 = vrot.slane %v2079_v49, %v426_v14 }
 0x11b   : > { %v2241_v40 = vrot.slane %v2076_v48, %v426_v14  ;;  %v2248_v46 = vrot.slane %v2070_v44, %v426_v14 }
 0x11c   : > { %v546_v58 = vpop.permute.xlu1 %545  ;;  %v544_v63 = vpop.permute.xlu0 %543  ;;  %v762_v0 = vpack.c.bf16 %v621_v53, %v600_v38  ;;  %v765_v1 = vpack.c.bf16 %v624_v56, %v603_v52  ;;  %v764_v8 = vpack.c.bf16 %v623_v54, %v602_v42 }
 0x11d   : > { %v556_v24 = vsel %vm553_vm9, %v544_v63, %v546_v58 }
 0x11e   : > { %811 = vmatpush1.bf16.msra.mxu0 %v762_v0  ;;  %851 = vmatprep.subr.bf16.mxu1 %v765_v1  ;;  %v559_v41 = vmul.f32 %v556_v24, %v2216_v22 }
 0x11f   : > { %852 = vmatpush1.bf16.msra.mxu1 %v764_v8 }
 0x120   : > { %v550_v17 = vpop.permute.xlu1 %549  ;;  %v548_v21 = vpop.permute.xlu0 %547 }
 0x121   : > { %v557_v45 = vsel %vm553_vm9, %v550_v17, %v544_v63  ;;  %v555_v42 = vsel %vm553_vm9, %v546_v58, %v548_v21  ;;  %v554_v47 = vsel %vm553_vm9, %v548_v21, %v550_v17  ;;  %v717_v21 = vld [vmem:[%s2553_s3] sm:$0xf] }
 0x122   : > { %v558_v52 = vmul.f32 %v557_v45, %v2225_v37  ;;  %v560_v48 = vmul.f32 %v555_v42, %v2228_v27  ;;  %v561_v63 = vmul.f32 %v554_v47, %v2231_v28 }
 0x124   : > { %v569_v29 = vpop.permute.xlu1 %568  ;;  %v567_v34 = vpop.permute.xlu0 %566 }
 0x125   : > { %v577_v38 = vsel %vm574_vm10, %v567_v34, %v569_v29 }
 0x126   : > { %v580_v43 = vmul.f32 %v577_v38, %v2219_v23 }
 0x128   : > { %v573_v49 = vpop.permute.xlu1 %572  ;;  %v571_v53 = vpop.permute.xlu0 %570  ;;  %v759_v54 = vpack.c.bf16 %v580_v43, %v559_v41 }
 0x129   : > { %v578_v56 = vsel %vm574_vm10, %v573_v49, %v567_v34  ;;  %v575_v58 = vsel %vm574_vm10, %v571_v53, %v573_v49  ;;  %v576_v44 = vsel %vm574_vm10, %v569_v29, %v571_v53  ;;  %v339_v53 = vadd.f32 %v1973_v5, %v1963_v3 }
 0x12a   : > { %v579_v0 = vmul.f32 %v578_v56, %v2238_v39  ;;  %v581_v1 = vmul.f32 %v576_v44, %v2241_v40  ;;  %v582_v8 = vmul.f32 %v575_v58, %v2248_v46  ;;  %812 = vmatprep.subr.bf16.mxu0 %v759_v54  ;;  %v2346_v54 = vld [vmem:[%s1944_s15] sm:$0xff]  ;;  %v2354_v58 = vld [vmem:[%s1944_s15 + $0x10] sm:$0xff]  ;;  %v2357_v44 = vld [vmem:[%s1944_s15 + $0x18] sm:$0xff] }
 0x12c   : > { %v758_v9 = vpack.c.bf16 %v579_v0, %v558_v52  ;;  %v761_v14 = vpack.c.bf16 %v582_v8, %v561_v63  ;;  %v760_v17 = vpack.c.bf16 %v581_v1, %v560_v48  ;;  %v2349_v48 = vld [vmem:[%s1944_s15 + $0x8] sm:$0xff]  ;;  %v381_v63 = vadd.f32 %v1970_v4, %v1960_v2  ;;  %s1621_s15 = scalar_lea.vmem %s2501_s12, 512 }
 0x12d   : > { %v320_v56 = vadd.f32 %v2349_v48, %v2346_v54  ;;  %v362_v0 = vadd.f32 %v2357_v44, %v2354_v58  ;;  %p1622_p12 = scmp.ne.s32.totalorder %s2501_s12, %s1621_s15 }
 0x12e   : > { %813 = vmatpush1.bf16.msra.mxu0 %v758_v9  ;;  %853 = vmatprep.subr.bf16.mxu1 %v761_v14 }
 0x12f   : > { %854 = vmatpush1.bf16.msra.mxu1 %v760_v17  ;;  %p1623_p9 = pnand %p1622_p12, %p2575_p3 }
 0x131   : > { %1394 = vmatmul.mubr.msk.bf16.vlgmr.msra.gmra.mxu0 %vm778_vm11, %v717_v21  ;;  %p1624_p13 = pneg %p1623_p9 }
 0x132   : > { %1395 = vmatmul.mubr.msk.bf16.vlgmr.msra.gmra.mxu1 %vm778_vm11, %v717_v21  ;;  %1162 = vmatprep.mubr.bf16.mxu0 %v1717_v6  ;;  %v1086_v21 = vld [vmem:[#allocation2 + $0x120] sm:$0x1] }
 0x133   : > { %1205 = vmatprep.mubr.bf16.mxu1 %v1717_v6 }
 0x1f1   : > { %v832_v24 = vpop.f32.mrf.mxu0 }
 0x1f2   : > { %v2271_v29 = vmax.f32 %v832_v24, 0.0  ;;  %v873_v34 = vpop.f32.mrf.mxu1 }
 0x1f3   : > { %v2273_v45 = vmax.f32 %v873_v34, 0.0  ;;  %v834_v38 = vpop.f32.mrf.mxu0  ;;  %v1087_v34 = vld [vmem:[#allocation2 + $0x128] sm:$0x1] }
 0x1f4   : > { %v2275_v41 = vmax.f32 %v834_v38, 0.0  ;;  %v875_v42 = vpop.f32.mrf.mxu1  ;;  %1028 = vrot.lane.b32.xlu0 %v2271_v29, %s1710_s24 }
 0x1f5   : > { %v2279_v43 = vmax.f32 %v875_v42, 0.0  ;;  %v836_v47 = vpop.f32.mrf.mxu0 }
 0x1f6   : > { %v877_v52 = vpop.f32.mrf.mxu1  ;;  %1030 = vrot.lane.b32.xlu1 %v2275_v41, %s1710_s24 }
 0x1f7   : > { %v837_v6 = vpop.f32.mrf.mxu0 }
 0x1f8   : > { %v878_v49 = vpop.f32.mrf.mxu1  ;;  %1032 = vrot.lane.b32.xlu0 %v2273_v45, %s1710_s24  ;;  %v1089_v6 = vld [vmem:[#allocation2 + $0x138] sm:$0x1] }
 0x1f9   : > { %v1088_v49 = vld [vmem:[#allocation2 + $0x130] sm:$0x1] }
 0x1fa   : > { %1034 = vrot.lane.b32.xlu1 %v2279_v43, %s1710_s24  ;;  %s1720_s24 = smov [#allocation11]  }
 0x1fc   : > { %988 = vrot.lane.b32.xlu0 %v2271_v29, %s1711_s27 }
 0x1fe   : > { %990 = vrot.lane.b32.xlu1 %v2275_v41, %s1711_s27 }
 0x200   : > { %992 = vrot.lane.b32.xlu0 %v2273_v45, %s1711_s27 }
 0x202   : > { %994 = vrot.lane.b32.xlu1 %v2279_v43, %s1711_s27  ;;  %s1625_s27 = sshll.u32 %s1720_s24, 4  ;;  %s1626_s27 = int_to_ptr.vmem [resolvable:$false] %s1625_s27 }
 0x203   : > { %p1628_p5 = scmp.lt.s32.totalorder %s2501_s12, %s1626_s27 }
 0x204   : > { %1008 = vrot.lane.b32.xlu0 %v2271_v29, %s1712_s29 }
 0x206   : > { %1010 = vrot.lane.b32.xlu1 %v2275_v41, %s1712_s29 }
 0x208   : > { %1012 = vrot.lane.b32.xlu0 %v2273_v45, %s1712_s29 }
 0x20a   : > { %1014 = vrot.lane.b32.xlu1 %v2279_v43, %s1712_s29  ;;  %s1627_s29 = scalar_lea.vmem %s1626_s27, 1024 }
 0x20b   : > { %p1629_p1 = scmp.lt.s32.totalorder %s1627_s29, %s1621_s15 }
 0x20c   : > { %968 = vrot.lane.b32.xlu0 %v2271_v29, %s1713_s16 }
 0x20d   : > { %p1630_p4 = por %p1629_p1, %p1628_p5 }
 0x20e   : > { %970 = vrot.lane.b32.xlu1 %v2275_v41, %s1713_s16 }
 0x20f   : > { %p1631_p7 = pnand %p1630_p4, %p1624_p13 }
 0x210   : > { %972 = vrot.lane.b32.xlu0 %v2273_v45, %s1713_s16 }
 0x212   : > { %974 = vrot.lane.b32.xlu1 %v2279_v43, %s1713_s16 }
 0x214   : > { %924 = vrot.lane.b32.xlu0 %v2271_v29, %s1714_s6 }
 0x216   : > { %926 = vrot.lane.b32.xlu1 %v2275_v41, %s1714_s6 }
 0x218   : > { %928 = vrot.lane.b32.xlu0 %v2273_v45, %s1714_s6 }
 0x21a   : > { %930 = vrot.lane.b32.xlu1 %v2279_v43, %s1714_s6 }
 0x21c   : > { %944 = vrot.lane.b32.xlu0 %v2271_v29, %s1715_s14 }
 0x21e   : > { %946 = vrot.lane.b32.xlu1 %v2275_v41, %s1715_s14 }
 0x220   : > { %948 = vrot.lane.b32.xlu0 %v2273_v45, %s1715_s14 }
 0x222   : > { %950 = vrot.lane.b32.xlu1 %v2279_v43, %s1715_s14 }
 0x224   : > { %884 = vrot.lane.b32.xlu0 %v2271_v29, %s1716_s8 }
 0x226   : > { %886 = vrot.lane.b32.xlu1 %v2275_v41, %s1716_s8 }
 0x228   : > { %888 = vrot.lane.b32.xlu0 %v2273_v45, %s1716_s8 }
 0x22a   : > { %890 = vrot.lane.b32.xlu1 %v2279_v43, %s1716_s8 }
 0x22c   : > { %904 = vrot.lane.b32.xlu0 %v2271_v29, %s1718_s7 }
 0x22e   : > { %906 = vrot.lane.b32.xlu1 %v2275_v41, %s1718_s7 }
 0x230   : > { %908 = vrot.lane.b32.xlu0 %v2273_v45, %s1718_s7 }
 0x232   : > { %910 = vrot.lane.b32.xlu1 %v2279_v43, %s1718_s7 }
 0x24f   : > { %340 = vadd.xlane.f32.xlu0 %v339_v53 }
 0x253   : > { %321 = vadd.xlane.f32.xlu0 %v320_v56 }
 0x256   : > { %382 = vadd.xlane.f32.xlu1 %v381_v63 }
 0x257   : > { %363 = vadd.xlane.f32.xlu0 %v362_v0 }
 0x266   : > { %v1029_v1 = vpop.permute.xlu0 %1028 }
 0x268   : > { %v1031_v8 = vpop.permute.xlu1 %1030 }
 0x269   : > { %v1038_v9 = vsel %vm704_vm2, %v1029_v1, %v1031_v8 }
 0x26a   : > { %v1040_v14 = vmul.f32 %v2045_v12, %v1038_v9  ;;  %v1033_v17 = vpop.permute.xlu0 %1032 }
 0x26b   : > { %v1037_v24 = vsel %vm704_vm2, %v1031_v8, %v1033_v17 }
 0x26c   : > { %v1041_v2 = vmul.f32 %v2047_v13, %v1037_v24  ;;  %v1035_v38 = vpop.permute.xlu1 %1034  ;;  %v1106_v52 = vpack.c.bf16 %v1086_v21, %v1040_v14 }
 0x26d   : > { %v1036_v42 = vsel %vm704_vm2, %v1033_v17, %v1035_v38  ;;  %v1039_v47 = vsel %vm704_vm2, %v1035_v38, %v1029_v1 }
 0x26e   : > { %v1042_v12 = vmul.f32 %v2040_v10, %v1036_v42  ;;  %v1043_v53 = vmul.f32 %v2043_v11, %v1039_v47  ;;  %v989_v56 = vpop.permute.xlu0 %988  ;;  %v1107_v63 = vpack.c.bf16 %v1087_v34, %v1041_v2  ;;  %v1119_v24 = vand.u32 %v1106_v52, %v2061_v30 }
 0x270   : > { %v991_v0 = vpop.permute.xlu1 %990  ;;  %v1122_v8 = vand.u32 %v1107_v63, %v2061_v30  ;;  %v1109_v13 = vpack.c.bf16 %v1089_v6, %v1043_v53  ;;  %v1108_v9 = vpack.c.bf16 %v1088_v49, %v1042_v12 }
 0x271   : > { %v998_v17 = vsel %vm662_vm5, %v989_v56, %v991_v0 }
 0x272   : > { %v1000_v1 = vmul.f32 %v998_v17, %v2110_v62  ;;  %v993_v14 = vpop.permute.xlu0 %992  ;;  %1136 = vmatprep.subr.bf16.mxu0 %v1122_v8  ;;  %v1128_v10 = vand.u32 %v1109_v13, %v2061_v30  ;;  %v1125_v11 = vand.u32 %v1108_v9, %v2061_v30 }
 0x273   : > { %v997_v21 = vsel %vm662_vm5, %v991_v0, %v993_v14  ;;  %1137 = vmatpush1.bf16.msra.mxu0 %v1119_v24 }
 0x274   : > { %v1001_v34 = vmul.f32 %v997_v21, %v2086_v51  ;;  %v995_v2 = vpop.permute.xlu1 %994  ;;  %1179 = vmatprep.subr.bf16.mxu1 %v1128_v10 }
 0x275   : > { %v996_v38 = vsel %vm662_vm5, %v993_v14, %v995_v2  ;;  %v999_v62 = vsel %vm662_vm5, %v995_v2, %v989_v56  ;;  %1180 = vmatpush1.bf16.msra.mxu1 %v1125_v11 }
 0x276   : > { %v1002_v42 = vmul.f32 %v996_v38, %v2091_v55  ;;  %v1003_v47 = vmul.f32 %v999_v62, %v2083_v50  ;;  %v1009_v30 = vpop.permute.xlu0 %1008 }
 0x278   : > { %v1011_v52 = vpop.permute.xlu1 %1010 }
 0x279   : > { %v1018_v6 = vsel %vm683_vm4, %v1009_v30, %v1011_v52 }
 0x27a   : > { %v1020_v51 = vmul.f32 %v1018_v6, %v2096_v57  ;;  %v1013_v49 = vpop.permute.xlu0 %1012 }
 0x27b   : > { %v1017_v12 = vsel %vm683_vm4, %v1011_v52, %v1013_v49 }
 0x27c   : > { %v1021_v53 = vmul.f32 %v1017_v12, %v2104_v60  ;;  %v1015_v63 = vpop.permute.xlu1 %1014  ;;  %v1102_v57 = vpack.c.bf16 %v1020_v51, %v1000_v1 }
 0x27d   : > { %v1016_v56 = vsel %vm683_vm4, %v1013_v49, %v1015_v63  ;;  %v1019_v50 = vsel %vm683_vm4, %v1015_v63, %v1009_v30 }
 0x27e   : > { %v1022_v55 = vmul.f32 %v1016_v56, %v2107_v61  ;;  %v1023_v0 = vmul.f32 %v1019_v50, %v2101_v59  ;;  %v969_v8 = vpop.permute.xlu0 %968  ;;  %v1103_v13 = vpack.c.bf16 %v1021_v53, %v1001_v34 }
 0x280   : > { %v971_v9 = vpop.permute.xlu1 %970  ;;  %1138 = vmatprep.subr.bf16.mxu0 %v1103_v13  ;;  %v1105_v17 = vpack.c.bf16 %v1023_v0, %v1003_v47  ;;  %v1104_v24 = vpack.c.bf16 %v1022_v55, %v1002_v42 }
 0x281   : > { %v978_v60 = vsel %vm641_vm6, %v969_v8, %v971_v9  ;;  %1139 = vmatpush1.bf16.msra.mxu0 %v1102_v57 }
 0x282   : > { %v980_v14 = vmul.f32 %v978_v60, %v2133_v31  ;;  %v973_v10 = vpop.permute.xlu0 %972  ;;  %1181 = vmatprep.subr.bf16.mxu1 %v1105_v17 }
 0x283   : > { %v977_v61 = vsel %vm641_vm6, %v971_v9, %v973_v10  ;;  %1182 = vmatpush1.bf16.msra.mxu1 %v1104_v24 }
 0x284   : > { %v981_v59 = vmul.f32 %v977_v61, %v2141_v35  ;;  %v975_v11 = vpop.permute.xlu1 %974  ;;  %v1098_v62 = vpack.c.bf16 %v980_v14, %v2271_v29 }
 0x285   : > { %v976_v1 = vsel %vm641_vm6, %v973_v10, %v975_v11  ;;  %v979_v21 = vsel %vm641_vm6, %v975_v11, %v969_v8 }
 0x286   : > { %v982_v34 = vmul.f32 %v976_v1, %v2144_v36  ;;  %v983_v2 = vmul.f32 %v979_v21, %v2136_v32  ;;  %v925_v31 = vpop.permute.xlu0 %924  ;;  %v1099_v38 = vpack.c.bf16 %v981_v59, %v2275_v41 }
 0x288   : > { %v927_v42 = vpop.permute.xlu1 %926  ;;  %1140 = vmatprep.subr.bf16.mxu0 %v1099_v38  ;;  %v1101_v35 = vpack.c.bf16 %v983_v2, %v2279_v43  ;;  %v1100_v47 = vpack.c.bf16 %v982_v34, %v2273_v45 }
 0x289   : > { %v934_v30 = vsel %vm595_vm7, %v925_v31, %v927_v42  ;;  %1141 = vmatpush1.bf16.msra.mxu0 %v1098_v62 }
 0x28a   : > { %v937_v52 = vmul.f32 %v934_v30, %v2164_v15  ;;  %v929_v36 = vpop.permute.xlu0 %928  ;;  %1183 = vmatprep.subr.bf16.mxu1 %v1101_v35 }
 0x28b   : > { %v933_v32 = vsel %vm595_vm7, %v927_v42, %v929_v36  ;;  %1184 = vmatpush1.bf16.msra.mxu1 %v1100_v47 }
 0x28c   : > { %v938_v29 = vmul.f32 %v933_v32, %v2176_v19  ;;  %v931_v41 = vpop.permute.xlu1 %930 }
 0x28d   : > { %v932_v43 = vsel %vm595_vm7, %v929_v36, %v931_v41  ;;  %v935_v45 = vsel %vm595_vm7, %v931_v41, %v925_v31 }
 0x28e   : > { %v936_v6 = vmul.f32 %v935_v45, %v2173_v18  ;;  %v939_v51 = vmul.f32 %v932_v43, %v2179_v20  ;;  %v945_v15 = vpop.permute.xlu0 %944 }
 0x290   : > { %v947_v49 = vpop.permute.xlu1 %946 }
 0x291   : > { %v954_v12 = vsel %vm616_vm8, %v945_v15, %v947_v49 }
 0x292   : > { %v957_v53 = vmul.f32 %v954_v12, %v2167_v16  ;;  %v949_v63 = vpop.permute.xlu0 %948 }
 0x293   : > { %v953_v19 = vsel %vm616_vm8, %v947_v49, %v949_v63 }
 0x294   : > { %v958_v56 = vmul.f32 %v953_v19, %v2189_v26  ;;  %v951_v50 = vpop.permute.xlu1 %950  ;;  %v1095_v55 = vpack.c.bf16 %v957_v53, %v937_v52  ;;  %v1503_v52 = vld [vmem:[#allocation9] sm:$0xff]  }
 0x295   : > { %v952_v18 = vsel %vm616_vm8, %v949_v63, %v951_v50  ;;  %v955_v20 = vsel %vm616_vm8, %v951_v50, %v945_v15  ;;  %v1512_v63 = vld [vmem:[%s1936_s13 + $0x10] sm:$0xff]  ;;  %s1412_s13 = sshll.u32 %s1773_s22, 9  ;;  %s1238_s22 = scalar_lea.sflag [#allocation5], %s1929_s2 }
 0x296   : > { %v956_v0 = vmul.f32 %v955_v20, %v2186_v25  ;;  %v959_v8 = vmul.f32 %v952_v18, %v2196_v33  ;;  %v885_v13 = vpop.permute.xlu0 %884  ;;  %1142 = vmatprep.subr.bf16.mxu0 %v1095_v55  ;;  %v1096_v17 = vpack.c.bf16 %v958_v56, %v938_v29  ;;  %s2506_s26 = scalar_lea.hbm %s2555_s5, %s1412_s13 }
 0x298   : > { %v887_v16 = vpop.permute.xlu1 %886  ;;  %v1094_v57 = vpack.c.bf16 %v956_v0, %v936_v6  ;;  %v1097_v9 = vpack.c.bf16 %v959_v8, %v939_v51 }
 0x299   : > { %v894_v26 = vsel %vm553_vm9, %v885_v13, %v887_v16 }
 0x29a   : > { %v897_v24 = vmul.f32 %v894_v26, %v2216_v22  ;;  %v889_v60 = vpop.permute.xlu0 %888  ;;  %1143 = vmatpush1.bf16.msra.mxu0 %v1094_v57  ;;  %1185 = vmatprep.subr.bf16.mxu1 %v1097_v9 }
 0x29b   : > { %v893_v14 = vsel %vm553_vm9, %v887_v16, %v889_v60  ;;  %1186 = vmatpush1.bf16.msra.mxu1 %v1096_v17 }
 0x29c   : > { %v898_v25 = vmul.f32 %v893_v14, %v2228_v27  ;;  %v891_v33 = vpop.permute.xlu1 %890 }
 0x29d   : > { %v892_v10 = vsel %vm553_vm9, %v889_v60, %v891_v33  ;;  %v895_v61 = vsel %vm553_vm9, %v891_v33, %v885_v13 }
 0x29e   : > { %v896_v59 = vmul.f32 %v895_v61, %v2225_v37  ;;  %v899_v22 = vmul.f32 %v892_v10, %v2231_v28  ;;  %v905_v11 = vpop.permute.xlu0 %904 }
 0x2a0   : > { %v907_v1 = vpop.permute.xlu1 %906 }
 0x2a1   : > { %v914_v21 = vsel %vm574_vm10, %v905_v11, %v907_v1 }
 0x2a2   : > { %v917_v34 = vmul.f32 %v914_v21, %v2219_v23  ;;  %v909_v2 = vpop.permute.xlu0 %908 }
 0x2a3   : > { %v913_v27 = vsel %vm574_vm10, %v907_v1, %v909_v2 }
 0x2a4   : > { %v918_v31 = vmul.f32 %v913_v27, %v2241_v40  ;;  %v911_v38 = vpop.permute.xlu1 %910  ;;  %v1091_v62 = vpack.c.bf16 %v917_v34, %v897_v24 }
 0x2a5   : > { %v912_v37 = vsel %vm574_vm10, %v909_v2, %v911_v38  ;;  %v915_v28 = vsel %vm574_vm10, %v911_v38, %v905_v11 }
 0x2a6   : > { %v916_v42 = vmul.f32 %v915_v28, %v2238_v39  ;;  %v919_v35 = vmul.f32 %v912_v37, %v2248_v46  ;;  %1144 = vmatprep.subr.bf16.mxu0 %v1091_v62  ;;  %v1092_v30 = vpack.c.bf16 %v918_v31, %v898_v25 }
 0x2a8   : > { %v1090_v23 = vpack.c.bf16 %v916_v42, %v896_v59  ;;  %v1093_v47 = vpack.c.bf16 %v919_v35, %v899_v22 }
 0x2aa   : > { %1145 = vmatpush1.bf16.msra.mxu0 %v1090_v23  ;;  %1187 = vmatprep.subr.bf16.mxu1 %v1093_v47 }
 0x2ab   : > { %1188 = vmatpush1.bf16.msra.mxu1 %v1092_v30 }
 0x2ad   : > { %1397 = vmatmul.mubr.msk.bf16.vlgmr.msra.gmra.mxu0 %vm778_vm11, %v1503_v52 }
 0x2ae   : > { %1398 = vmatmul.mubr.msk.bf16.vlgmr.msra.gmra.mxu1 %vm778_vm11, %v1503_v52 }
 0x2d8   : > { %v341_v40 = vpop.xlane.xlu0 %340 }
 0x2d9   : > { %v2469_v36 = vmul.f32 0.00390625, %v341_v40 }
 0x2db   : > { %v343_v7 = vsub.f32 %v1963_v3, %v2469_v36  ;;  %v344_v39 = vsub.f32 %v1973_v5, %v2469_v36 }
 0x2dc   : > { %v322_v46 = vpop.xlane.xlu0 %321 }
 0x2dd   : > { %v324_v32 = vmul.f32 0.00390625, %v322_v46  ;;  %v345_v29 = vmul.f32 %v343_v7, %v343_v7  ;;  %v346_v41 = vmul.f32 %v344_v39, %v344_v39 }
 0x2df   : > { %v325_v43 = vsub.f32 %v2346_v54, %v324_v32  ;;  %v326_v45 = vsub.f32 %v2349_v48, %v324_v32  ;;  %v383_v6 = vpop.xlane.xlu1 %382  ;;  %v347_v51 = vadd.f32 %v346_v41, %v345_v29 }
 0x2e0   : > { %v2477_v15 = vmul.f32 0.00390625, %v383_v6  ;;  %v364_v49 = vpop.xlane.xlu0 %363 }
 0x2e1   : > { %348 = vadd.xlane.f32.xlu1 %v347_v51  ;;  %v365_v12 = vmul.f32 0.00390625, %v364_v49  ;;  %v327_v3 = vmul.f32 %v325_v43, %v325_v43  ;;  %v328_v53 = vmul.f32 %v326_v45, %v326_v45 }
 0x2e2   : > { %v385_v5 = vsub.f32 %v1512_v63, %v2477_v15  ;;  %v386_v19 = vsub.f32 %v1970_v4, %v2477_v15 }
 0x2e3   : > { %v2484_v56 = vsub.f32 %v2354_v58, %v365_v12  ;;  %v2487_v54 = vsub.f32 %v2357_v44, %v365_v12  ;;  %v329_v48 = vadd.f32 %v328_v53, %v327_v3 }
 0x2e4   : > { %v387_v50 = vmul.f32 %v385_v5, %v385_v5  ;;  %v388_v55 = vmul.f32 %v386_v19, %v386_v19 }
 0x2e5   : > { %330 = vadd.xlane.f32.xlu1 %v329_v48  ;;  %v368_v18 = vmul.f32 %v2484_v56, %v2484_v56  ;;  %v369_v20 = vmul.f32 %v2487_v54, %v2487_v54 }
 0x2e6   : > { %v389_v0 = vadd.f32 %v388_v55, %v387_v50 }
 0x2e7   : > { %v370_v8 = vadd.f32 %v369_v20, %v368_v18 }
 0x2e8   : > { %390 = vadd.xlane.f32.xlu0 %v389_v0 }
 0x2ec   : > { %371 = vadd.xlane.f32.xlu0 %v370_v8 }
 0x36a   : > { %v349_v4 = vpop.xlane.xlu1 %348 }
 0x36b   : > { %v351_v58 = vmul.f32 0.003921569, %v349_v4 }
 0x36d   : > { %1504 = vrsqrt.f32 %v351_v58  ;;  %v1164_v26 = vpop.f32.mrf.mxu0  ;;  %vm354_vm12 = vcmp.eq.f32.partialorder %v351_v58, inf  ;;  %v357_v61 = vand.u32 2147483648, %v351_v58  ;;  %vm356_vm13 = vcmp.eq.f32.partialorder %v351_v58, 0.0 }
 0x36e   : > { %v331_v13 = vpop.xlane.xlu1 %330  ;;  %v1207_v10 = vpop.f32.mrf.mxu1 }
 0x36f   : > { %v332_v44 = vmul.f32 0.00390625, %v331_v13  ;;  %v1166_v14 = vpop.f32.mrf.mxu0 }
 0x370   : > { %v1209_v1 = vpop.f32.mrf.mxu1 }
 0x371   : > { %v333_v16 = vadd.f32 1e-05, %v332_v44  ;;  %v391_v57 = vpop.xlane.xlu0 %390  ;;  %v1168_v59 = vpop.f32.mrf.mxu0 }
 0x372   : > { %v392_v9 = vmul.f32 0.003921569, %v391_v57  ;;  %v1218_v28 = vadd.f32 %v1168_v59, %v2469_v36  ;;  %v1211_v47 = vpop.f32.mrf.mxu1 }
 0x373   : > { %1506 = vrsqrt.f32 %v333_v16  ;;  %v1170_v34 = vpop.f32.mrf.mxu0  ;;  %v1228_v51 = vadd.f32 %v1211_v47, %v2477_v15 }
 0x374   : > { %1508 = vrsqrt.f32 %v392_v9  ;;  %vm395_vm14 = vcmp.eq.f32.partialorder %v392_v9, inf  ;;  %v398_v35 = vand.u32 2147483648, %v392_v9  ;;  %v1219_v30 = vadd.f32 %v1170_v34, %v2469_v36  ;;  %v1213_v32 = vpop.f32.mrf.mxu1 }
 0x375   : > { %v372_v17 = vpop.xlane.xlu0 %371  ;;  %vm397_vm15 = vcmp.eq.f32.partialorder %v392_v9, 0.0  ;;  %v1229_v49 = vadd.f32 %v1213_v32, %v2477_v15 }
 0x376   : > { %v373_v24 = vmul.f32 0.00390625, %v372_v17 }
 0x378   : > { %v374_v60 = vadd.f32 1e-05, %v373_v24 }
 0x37a   : > { %v1505_v25 = vpop.eup %1504  ;;  %1510 = vrsqrt.f32 %v374_v60 }
 0x37b   : > { %v353_v33 = vmul.f32 %v1505_v25, %v351_v58 }
 0x37d   : > { %v355_v22 = vsel %vm354_vm12, %v351_v58, %v353_v33 }
 0x37e   : > { %v358_v11 = vsel %vm356_vm13, %v357_v61, %v355_v22 }
 0x37f   : > { %v1216_v31 = vadd.f32 %v1164_v26, %v358_v11  ;;  %v1217_v62 = vadd.f32 %v1166_v14, %v358_v11 }
 0x380   : > { %v1507_v21 = vpop.eup %1506 }
 0x381   : > { %v1509_v2 = vpop.eup %1508  ;;  %v335_v27 = vmul.f32 %v1507_v21, %v325_v43  ;;  %v336_v38 = vmul.f32 %v1507_v21, %v326_v45 }
 0x382   : > { %v394_v37 = vmul.f32 %v1509_v2, %v392_v9 }
 0x383   : > { %v1220_v42 = vmul.f32 %v1216_v31, %v335_v27  ;;  %v1221_v23 = vmul.f32 %v1217_v62, %v336_v38 }
 0x384   : > { %v396_v52 = vsel %vm395_vm14, %v392_v9, %v394_v37 }
 0x385   : > { %v399_v40 = vsel %vm397_vm15, %v398_v35, %v396_v52  ;;  %v1222_v7 = vadd.f32 %v1220_v42, %v1218_v28  ;;  %v1223_v39 = vadd.f32 %v1221_v23, %v1219_v30 }
 0x386   : > { %v1226_v41 = vadd.f32 %v1207_v10, %v399_v40  ;;  %v1227_v45 = vadd.f32 %v1209_v1, %v399_v40 }
 0x387   : > { %v1511_v46 = vpop.eup %1510  ;;  %1224 = vst [vmem:[%s313_s23] sm:$0xff] %v1222_v7  ;;  %1225 = vst [vmem:[%s313_s23 + $0x8] sm:$0xff] %v1223_v39 }
 0x388   : > { %v376_v29 = vmul.f32 %v1511_v46, %v2484_v56  ;;  %v377_v43 = vmul.f32 %v1511_v46, %v2487_v54 }
 0x38a   : > { %v1230_v36 = vmul.f32 %v1226_v41, %v376_v29  ;;  %v1231_v6 = vmul.f32 %v1227_v45, %v377_v43 }
 0x38c   : > { %v1232_v12 = vadd.f32 %v1230_v36, %v1228_v51  ;;  %v1233_v3 = vadd.f32 %v1231_v6, %v1229_v49 }
 0x38e   : > { %1399 = vst [vmem:[%s313_s23 + $0x10] sm:$0xff] %v1232_v12  ;;  %1400 = vst [vmem:[%s313_s23 + $0x18] sm:$0xff] %v1233_v3 }
 0x38f   : > { %1634 = shalt.err (!%p1631_p7)
}
 0x390   : > { %s1635_s16 = scalar_lea.hbm %s2506_s26, 512  ;;  %s1639_s8 = scalar_lea.hbm %s2555_s5, 1024 }
 0x391   : > { %p1636_p2 = scmp.ne.s32.totalorder %s2506_s26, %s1635_s16  ;;  %p1640_p11 = scmp.lt.s32.totalorder %s2506_s26, %s2555_s5 }
 0x392   : > { %p1641_p10 = scmp.lt.s32.totalorder %s1639_s8, %s1635_s16 }
 0x393   : > { %p1637_p0 = pnand %p1636_p2, %p2575_p3 }
 0x394   : > { %p1642_p6 = por %p1641_p10, %p1640_p11 }
 0x395   : > { %p1638_p8 = pneg %p1637_p0 }
 0x397   : > { %p1643_p12 = pnand %p1642_p6, %p1638_p8 }
 0x399   : > { %1646 = shalt.err (!%p1643_p12)
}
 0x39a   : > { %s1721_s23 = smov 256  }
 0x39b   : > { %1425 = dma.vmem_to_hbm [thread:$0]  (%p2575_p3), %s2501_s12, 512, %s2506_s26, %s1238_s22, %s1721_s23, %s1721_s23, %s1718_s7  }
 0x39c PF: > { %s1267_s13 = sand.u32 1, %s1685_s18   ;;  %p2576_p9 = scmp.ne.s32.totalorder %s2562_s25, 0 }
 0x39d   : > { %p2577_p13 = scmp.ge.s32.totalorder %s1697_s21, 2  ;;  %s1268_s10 = scalar_lea.sflag [#allocation5], %s1267_s13 }
 0x39f   : > { %p1442_p5 = pnand %p2577_p13, %p2576_p9 }
 0x3a1   : > { %p1443_p1 = pneg %p1442_p5 }
 0x3a3   : > { %1680 = dma.done.wait (%p1443_p1), %s1268_s10, 512  }
 0x3a4   : > { %1682 = vsyncadd (%p1443_p1), %s1268_s10, 4294966784  ;;  %p22_p4 = scmp.ge.s32.totalorder %s1824_s17, 4   ;;  %s2578_s18 = smov %s1689_s19 }
 0x3a5   : > { %s2579_s19 = smov %s1693_s20  ;;  %s2580_s20 = smov %s1833_s28 }
 0x3a6   : > { %s2581_s21 = smov %s1824_s17  ;;  %24 = sbr.rel (!%p22_p4) target bundleno = 11 (0xb), region = 110 }
 0x3ab   :  { %1273 = vsyncpa [#allocation4], 1 }
 0x3ac   :  { %1275 = vsyncpa [#allocation4 + $0x1], 1 }
 0x3ad   :  { %1276 = vsyncpa [#allocation7], 1 }
 0x3ae   :  { %1278 = vsyncpa [#allocation7 + $0x1], 1 }
 0x3af   :  { %1279 = vsyncpa [#allocation10], 1 }
 0x3b0   :  { %1280 = vsyncpa [#allocation5], 1 }
 0x3b1   :  { %1282 = vsyncpa [#allocation5 + $0x1], 1 }

</bundles_post_ra>
